<compile_context>
chip_gen: v7x
topology: tpu7x:2x2x1
jax: 0.10.0
libtpu: 0.0.40
codegen_flags: <defaults>
</compile_context>

<pallas_src>
import math

import jax
import jax.numpy as jnp
from jax import lax
from jax.experimental import pallas as pl
from jax.experimental.pallas import tpu as pltpu

EMBEDDING_SIZE = 32
_NORM_PDF_COEF = 2.0 / math.sqrt(2.0 * math.pi)   # Normal(0, 0.5).pdf(0)


def _round_up(v, m):
    return ((v + m - 1) // m) * m


# --------------------------- kernel 1: batched EmbeddingNet --------------------------- #

def _make_embed_kernel(Bb, L1p, L2p, L5_valid):
    """EmbeddingNet forward for one block of Bb partition samples.

    pe/po: (Bb, L1p, 10) layer-1 im2col patches for the even/odd conv1 output rows.
    Per layer: (K*Cin, Cout) matmul weight and (3, Cout) [bias, bn_scale, bn_shift].
    Output: (Bb, 32) per-sample embedding (max-pool over the valid length).
    """
    E = EMBEDDING_SIZE
    C2 = 2 * E
    R = Bb * L2p                       # constant per-block row count for layers 2..5
    f32 = jnp.float32

    def affine(z, aux):
        # bn(relu(conv(x))): conv bias, ReLU, then eval-mode BN folded to scale/shift.
        return jnp.maximum(z + aux[0:1, :], 0.0) * aux[1:2, :] + aux[2:3, :]

    def kernel(pe_ref, po_ref,
               w1_ref, a1_ref, w2_ref, a2_ref, w3_ref, a3_ref,
               w4_ref, a4_ref, w5_ref, a5_ref,
               out_ref, h2s, h3s):
        w1 = w1_ref[...]
        a1 = a1_ref[...]
        kd = w1.shape[0]

        # conv1 (K=5, stride 1): one im2col matmul per parity plane.
        h1e = affine(jnp.dot(pe_ref[...].reshape(Bb * L1p, kd), w1,
                             preferred_element_type=f32), a1).reshape(Bb, L1p, E)
        h1o = affine(jnp.dot(po_ref[...].reshape(Bb * L1p, kd), w1,
                             preferred_element_type=f32), a1).reshape(Bb, L1p, E)

        # conv2 (K=3, stride 2): the three taps are static slices of the parity planes.
        w2 = w2_ref[...]
        z2 = jnp.dot(h1e[:, 0:L2p, :].reshape(R, E), w2[0:E, :],
                     preferred_element_type=f32)
        z2 = z2 + jnp.dot(h1o[:, 0:L2p, :].reshape(R, E), w2[E:2 * E, :],
                          preferred_element_type=f32)
        z2 = z2 + jnp.dot(h1e[:, 1:L2p + 1, :].reshape(R, E), w2[2 * E:3 * E, :],
                          preferred_element_type=f32)
        h2s[0:R, :] = affine(z2, a2_ref[...])
        h2s[R:R + 8, :] = jnp.zeros((8, C2), f32)

        # conv3 (K=3, stride 1): shifted-row tap matmuls at constant per-sample pitch.
        w3 = w3_ref[...]
        z3 = jnp.dot(h2s[0:R, :], w3[0:C2, :], preferred_element_type=f32)
        z3 = z3 + jnp.dot(h2s[1:R + 1, :], w3[C2:2 * C2, :], preferred_element_type=f32)
        z3 = z3 + jnp.dot(h2s[2:R + 2, :], w3[2 * C2:3 * C2, :], preferred_element_type=f32)
        h3s[0:R, :] = affine(z3, a3_ref[...])
        h3s[R:R + 8, :] = jnp.zeros((8, E), f32)

        # conv4 (K=3, stride 1)
        w4 = w4_ref[...]
        z4 = jnp.dot(h3s[0:R, :], w4[0:E, :], preferred_element_type=f32)
        z4 = z4 + jnp.dot(h3s[1:R + 1, :], w4[E:2 * E, :], preferred_element_type=f32)
        z4 = z4 + jnp.dot(h3s[2:R + 2, :], w4[2 * E:3 * E, :], preferred_element_type=f32)
        h4 = affine(z4, a4_ref[...])

        # conv5 (K=1)
        h5 = affine(jnp.dot(h4, w5_ref[...], preferred_element_type=f32), a5_ref[...])

        # max_pool1d over the full (valid) length, per sample.
        h5r = h5.reshape(Bb, L2p, E)
        off = lax.broadcasted_iota(jnp.int32, (Bb, L2p, E), 1)
        hm = jnp.where(off < L5_valid, h5r, -jnp.inf)
        out_ref[...] = jnp.max(hm, axis=1)
        # TODO(synk): Dropout(0.25) after the max-pool is identity (eval mode).

    return kernel


def _full_spec(shape):
    zeros = (0,) * len(shape)
    return pl.BlockSpec(tuple(shape), lambda g, _z=zeros: _z)


def embed_partitions(x_nlc, params):
    """Run EmbeddingNet on (NS, S, 2) channels-last inputs. Returns (NS, 32) embeddings."""
    NS, S, D = x_nlc.shape
    K1 = 5
    L1 = S - (K1 - 1)                      # conv1 (stride 1)
    L2 = (L1 - 3) // 2 + 1                 # conv2 (stride 2)
    L3 = L2 - 2                            # conv3
    L4 = L3 - 2                            # conv4
    L5 = L4                                # conv5 (K=1)
    assert L5 >= 1, "partition_size too small for the conv stack"

    L2p = _round_up(L2, 8)                 # per-sample row pitch for layers 2..5
    L1e = (L1 + 1) // 2                    # number of even conv1 output rows
    L1o = L1 // 2                          # number of odd conv1 output rows
    L1p = _round_up(max(L1e, L2p + 1), 8)  # parity-plane pitch

    # Layer-1 im2col patches (tap-major, channel-minor), split by conv1-output-row parity.
    patches = jnp.concatenate([x_nlc[:, t:t + L1, :] for t in range(K1)], axis=-1)
    pe = jnp.pad(patches[:, 0::2, :], ((0, 0), (0, L1p - L1e), (0, 0)))
    po = jnp.pad(patches[:, 1::2, :], ((0, 0), (0, L1p - L1o), (0, 0)))

    Bb = min(64, NS)                       # samples per grid step (VMEM stays tiny)
    NSp = _round_up(NS, Bb)
    if NSp != NS:
        pe = jnp.pad(pe, ((0, NSp - NS), (0, 0), (0, 0)))
        po = jnp.pad(po, ((0, NSp - NS), (0, 0), (0, 0)))

    kernel = _make_embed_kernel(Bb, L1p, L2p, L5)
    KD = K1 * D
    R = Bb * L2p

    out = pl.pallas_call(
        kernel,
        out_shape=jax.ShapeDtypeStruct((NSp, EMBEDDING_SIZE), jnp.float32),
        grid_spec=pltpu.PrefetchScalarGridSpec(
            num_scalar_prefetch=0,
            grid=(NSp // Bb,),
            in_specs=[
                pl.BlockSpec((Bb, L1p, KD), lambda g: (g, 0, 0)),
                pl.BlockSpec((Bb, L1p, KD), lambda g: (g, 0, 0)),
            ] + [_full_spec(p.shape) for p in params],
            out_specs=pl.BlockSpec((Bb, EMBEDDING_SIZE), lambda g: (g, 0)),
            scratch_shapes=[
                pltpu.VMEM((R + 8, 2 * EMBEDDING_SIZE), jnp.float32),
                pltpu.VMEM((R + 8, EMBEDDING_SIZE), jnp.float32),
            ],
        ),
        compiler_params=pltpu.CompilerParams(dimension_semantics=("parallel",)),
    )(pe, po, *params)
    return out[:NS]


# -------------------- kernel 2: distance-weighted partition pooling ------------------- #

def _aggregate_kernel(c_ref, ct_ref, m_ref, h_ref, out_ref):
    """h_out = sum_i sum_j N(0,0.5).pdf(||c_i - c_j||) * mask_j * h_j  (one batch element)."""
    c = c_ref[...]                                        # (P, D) partition centers
    ct = ct_ref[...]                                      # (D, P)
    h = h_ref[...]                                        # (P, E) partition embeddings
    m = m_ref[...]                                        # (P, 1) partition-limit mask

    gram = jnp.dot(c, ct, preferred_element_type=jnp.float32)        # (P, P)
    n_col = jnp.sum(c * c, axis=1, keepdims=True)                    # (P, 1)
    n_row = jnp.sum(ct * ct, axis=0, keepdims=True)                  # (1, P)
    sq = jnp.maximum(n_col + n_row - 2.0 * gram, 0.0)                # ||c_i - c_j||^2
    # sum over i of pdf(d_ij); sq is symmetric, so reduce along the lane axis.
    wsum = _NORM_PDF_COEF * jnp.sum(jnp.exp(-2.0 * sq), axis=1, keepdims=True)  # (P, 1)
    w = wsum * m                                                     # (P, 1)
    out_ref[...] = jnp.sum(w * h, axis=0, keepdims=True)             # (1, E)


def aggregate_partitions(centers, maskf, h_in):
    B, P, D = centers.shape
    E = EMBEDDING_SIZE
    centers_t = jnp.transpose(centers, (0, 2, 1))                    # (B, D, P)
    out = pl.pallas_call(
        _aggregate_kernel,
        out_shape=jax.ShapeDtypeStruct((B, 1, E), jnp.float32),
        grid_spec=pltpu.PrefetchScalarGridSpec(
            num_scalar_prefetch=0,
            grid=(B,),
            in_specs=[
                pl.BlockSpec((None, P, D), lambda b: (b, 0, 0)),
                pl.BlockSpec((None, D, P), lambda b: (b, 0, 0)),
                pl.BlockSpec((None, P, 1), lambda b: (b, 0, 0)),
                pl.BlockSpec((None, P, E), lambda b: (b, 0, 0)),
            ],
            out_specs=pl.BlockSpec((None, 1, E), lambda b: (b, 0, 0)),
        ),
        compiler_params=pltpu.CompilerParams(dimension_semantics=("parallel",)),
    )(centers, centers_t, maskf, h_in)
    return out[:, 0, :]


# ----------------------------------- wrapper ------------------------------------------ #

@jax.jit
def structured_embedding_net(x, l, params):
    """x: (B, P, S+1, D) float32, l: (B,) int. Returns h_out: (B, EMBEDDING_SIZE)."""
    B, P, S1, D = x.shape
    S = S1 - 1
    x = x.astype(jnp.float32)
    centers = x[:, :, S, :]                                          # (B, P, D)
    # TODO(synk): the reference calls .view() on a non-contiguous slice (raises in PyTorch);
    # we implement the intended row-major reshape reinterpretation.
    c_in = x[:, :, :S, :].reshape(B * P, D, S)                       # (B*P, 2, S)  NCL
    x_nlc = jnp.transpose(c_in, (0, 2, 1))                           # (B*P, S, 2)

    h_emb = embed_partitions(x_nlc, params)                          # (B*P, 32)
    h_in = h_emb.reshape(B, P, EMBEDDING_SIZE)

    maskf = (jnp.arange(P, dtype=jnp.int32)[None, :] <= l[:, None]).astype(jnp.float32)
    maskf = maskf[:, :, None]                                        # (B, P, 1)
    return aggregate_partitions(centers, maskf, h_in)                # (B, 32)


# ------------------------------- parameter init --------------------------------------- #

def init_params(key):
    """Synthetic EmbeddingNet parameters, packed per layer as
    (K*Cin, Cout) im2col/tap-major weight and (3, Cout) [bias, bn_scale, bn_shift]."""
    E = EMBEDDING_SIZE
    eps = 1e-5
    cfgs = [(5, 2, E), (3, E, 2 * E), (3, 2 * E, E), (3, E, E), (1, E, E)]
    params = []
    for (K, ci, co) in cfgs:
        key, kw, kb, kg, kbt = jax.random.split(key, 5)
        std = 1.0 / float(ci * K) ** 0.5
        w = std * jax.random.normal(kw, (K, ci, co), jnp.float32)    # taps-major layout
        b = std * jax.random.normal(kb, (1, co), jnp.float32)
        gamma = 1.0 + 0.1 * jax.random.normal(kg, (1, co), jnp.float32)
        beta = 0.1 * jax.random.normal(kbt, (1, co), jnp.float32)
        # TODO(synk): BatchNorm1d folded in eval mode (running_mean=0, running_var=1).
        scale = gamma / jnp.sqrt(1.0 + eps)
        shift = beta
        params.append(w.reshape(K * ci, co))
        params.append(jnp.concatenate([b, scale, shift], axis=0))    # (3, co)
    return params


# ----------------------------------- main ---------------------------------------------- #

if __name__ == "__main__":
    key = jax.random.PRNGKey(0)
    B, P, S1, D = 2, 4, 33, 2            # batch=2, 4 partitions of 32 points (+1 center), 2-D
    kx, kp = jax.random.split(key, 2)
    x = jax.random.normal(kx, (B, P, S1, D), jnp.float32)
    l = jnp.array([2, 3], dtype=jnp.int32)   # per-batch partition limits
    params = init_params(kp)

    h_out = structured_embedding_net(x, l, params)
    h_out = jax.block_until_ready(h_out)

    assert h_out.shape == (B, EMBEDDING_SIZE), h_out.shape
    assert bool(jnp.all(jnp.isfinite(h_out)))
    print("KERNEL_OK")
</pallas_src>

<mosaic_0001>
module attributes {stable_mosaic.version = 11 : i64} {
  func.func @kernel(%arg0: i32, %arg1: memref<8x24x10xf32, #tpu.memory_space<vmem>>, %arg2: memref<8x24x10xf32, #tpu.memory_space<vmem>>, %arg3: memref<10x32xf32, #tpu.memory_space<vmem>>, %arg4: memref<3x32xf32, #tpu.memory_space<vmem>>, %arg5: memref<96x64xf32, #tpu.memory_space<vmem>>, %arg6: memref<3x64xf32, #tpu.memory_space<vmem>>, %arg7: memref<192x32xf32, #tpu.memory_space<vmem>>, %arg8: memref<3x32xf32, #tpu.memory_space<vmem>>, %arg9: memref<96x32xf32, #tpu.memory_space<vmem>>, %arg10: memref<3x32xf32, #tpu.memory_space<vmem>>, %arg11: memref<32x32xf32, #tpu.memory_space<vmem>>, %arg12: memref<3x32xf32, #tpu.memory_space<vmem>>, %arg13: memref<8x32xf32, #tpu.memory_space<vmem>>, %arg14: memref<136x64xf32, #tpu.memory_space<vmem>>, %arg15: memref<136x32xf32, #tpu.memory_space<vmem>>) attributes {dimension_semantics = [#tpu.dimension_semantics<parallel>], iteration_bounds = array<i64: 1>, scalar_prefetch = 0 : i64, scratch_operands = 2 : i64, tpu.core_type = #tpu.core_type<tc>, window_params = [{transform_indices = @transform_0, window_bounds = array<i64: 8, 24, 10>}, {transform_indices = @transform_1, window_bounds = array<i64: 8, 24, 10>}, {pipeline_mode = #tpu.pipeline_mode<synchronous>, transform_indices = @transform_2, window_bounds = array<i64: 10, 32>}, {pipeline_mode = #tpu.pipeline_mode<synchronous>, transform_indices = @transform_3, window_bounds = array<i64: 3, 32>}, {pipeline_mode = #tpu.pipeline_mode<synchronous>, transform_indices = @transform_4, window_bounds = array<i64: 96, 64>}, {pipeline_mode = #tpu.pipeline_mode<synchronous>, transform_indices = @transform_5, window_bounds = array<i64: 3, 64>}, {pipeline_mode = #tpu.pipeline_mode<synchronous>, transform_indices = @transform_6, window_bounds = array<i64: 192, 32>}, {pipeline_mode = #tpu.pipeline_mode<synchronous>, transform_indices = @transform_7, window_bounds = array<i64: 3, 32>}, {pipeline_mode = #tpu.pipeline_mode<synchronous>, transform_indices = @transform_8, window_bounds = array<i64: 96, 32>}, {pipeline_mode = #tpu.pipeline_mode<synchronous>, transform_indices = @transform_9, window_bounds = array<i64: 3, 32>}, {pipeline_mode = #tpu.pipeline_mode<synchronous>, transform_indices = @transform_10, window_bounds = array<i64: 32, 32>}, {pipeline_mode = #tpu.pipeline_mode<synchronous>, transform_indices = @transform_11, window_bounds = array<i64: 3, 32>}, {transform_indices = @transform_12, window_bounds = array<i64: 8, 32>}]} {
    %c0 = arith.constant 0 : index
    %c0_0 = arith.constant 0 : index
    %0 = vector.load %arg3[%c0, %c0_0] : memref<10x32xf32, #tpu.memory_space<vmem>>, vector<10x32xf32>
    %c0_1 = arith.constant 0 : index
    %c0_2 = arith.constant 0 : index
    %1 = vector.load %arg4[%c0_1, %c0_2] : memref<3x32xf32, #tpu.memory_space<vmem>>, vector<3x32xf32>
    %c0_3 = arith.constant 0 : index
    %c0_4 = arith.constant 0 : index
    %c0_5 = arith.constant 0 : index
    %2 = vector.load %arg1[%c0_3, %c0_4, %c0_5] : memref<8x24x10xf32, #tpu.memory_space<vmem>>, vector<8x24x10xf32>
    %3 = vector.shape_cast %2 : vector<8x24x10xf32> to vector<192x10xf32>
    %cst = arith.constant dense<0.000000e+00> : vector<192x32xf32>
    %4 = tpu.matmul %3, %0, %cst {dimension_numbers = #tpu.dot_dimension_numbers<[1], [0], [0], [1], [0, 0, 1, 1], [], []>} : vector<192x10xf32>, vector<10x32xf32>, vector<192x32xf32> -> vector<192x32xf32>
    %5 = vector.extract_strided_slice %1 {offsets = [0, 0], sizes = [1, 32], strides = [1, 1]} : vector<3x32xf32> to vector<1x32xf32>
    %6 = vector.broadcast %5 : vector<1x32xf32> to vector<192x32xf32>
    %7 = arith.addf %4, %6 : vector<192x32xf32>
    %cst_6 = arith.constant 0.000000e+00 : f32
    %8 = vector.broadcast %cst_6 : f32 to vector<192x32xf32>
    %9 = arith.maximumf %7, %8 : vector<192x32xf32>
    %10 = vector.extract_strided_slice %1 {offsets = [1, 0], sizes = [1, 32], strides = [1, 1]} : vector<3x32xf32> to vector<1x32xf32>
    %11 = vector.broadcast %10 : vector<1x32xf32> to vector<192x32xf32>
    %12 = arith.mulf %9, %11 : vector<192x32xf32>
    %13 = vector.extract_strided_slice %1 {offsets = [2, 0], sizes = [1, 32], strides = [1, 1]} : vector<3x32xf32> to vector<1x32xf32>
    %14 = vector.broadcast %13 : vector<1x32xf32> to vector<192x32xf32>
    %15 = arith.addf %12, %14 : vector<192x32xf32>
    %16 = vector.shape_cast %15 : vector<192x32xf32> to vector<8x24x32xf32>
    %c0_7 = arith.constant 0 : index
    %c0_8 = arith.constant 0 : index
    %c0_9 = arith.constant 0 : index
    %17 = vector.load %arg2[%c0_7, %c0_8, %c0_9] : memref<8x24x10xf32, #tpu.memory_space<vmem>>, vector<8x24x10xf32>
    %18 = vector.shape_cast %17 : vector<8x24x10xf32> to vector<192x10xf32>
    %cst_10 = arith.constant dense<0.000000e+00> : vector<192x32xf32>
    %19 = tpu.matmul %18, %0, %cst_10 {dimension_numbers = #tpu.dot_dimension_numbers<[1], [0], [0], [1], [0, 0, 1, 1], [], []>} : vector<192x10xf32>, vector<10x32xf32>, vector<192x32xf32> -> vector<192x32xf32>
    %20 = vector.extract_strided_slice %1 {offsets = [0, 0], sizes = [1, 32], strides = [1, 1]} : vector<3x32xf32> to vector<1x32xf32>
    %21 = vector.broadcast %20 : vector<1x32xf32> to vector<192x32xf32>
    %22 = arith.addf %19, %21 : vector<192x32xf32>
    %cst_11 = arith.constant 0.000000e+00 : f32
    %23 = vector.broadcast %cst_11 : f32 to vector<192x32xf32>
    %24 = arith.maximumf %22, %23 : vector<192x32xf32>
    %25 = vector.extract_strided_slice %1 {offsets = [1, 0], sizes = [1, 32], strides = [1, 1]} : vector<3x32xf32> to vector<1x32xf32>
    %26 = vector.broadcast %25 : vector<1x32xf32> to vector<192x32xf32>
    %27 = arith.mulf %24, %26 : vector<192x32xf32>
    %28 = vector.extract_strided_slice %1 {offsets = [2, 0], sizes = [1, 32], strides = [1, 1]} : vector<3x32xf32> to vector<1x32xf32>
    %29 = vector.broadcast %28 : vector<1x32xf32> to vector<192x32xf32>
    %30 = arith.addf %27, %29 : vector<192x32xf32>
    %31 = vector.shape_cast %30 : vector<192x32xf32> to vector<8x24x32xf32>
    %c0_12 = arith.constant 0 : index
    %c0_13 = arith.constant 0 : index
    %32 = vector.load %arg5[%c0_12, %c0_13] : memref<96x64xf32, #tpu.memory_space<vmem>>, vector<96x64xf32>
    %33 = vector.extract_strided_slice %16 {offsets = [0, 0, 0], sizes = [8, 16, 32], strides = [1, 1, 1]} : vector<8x24x32xf32> to vector<8x16x32xf32>
    %34 = vector.shape_cast %33 : vector<8x16x32xf32> to vector<128x32xf32>
    %35 = vector.extract_strided_slice %32 {offsets = [0, 0], sizes = [32, 64], strides = [1, 1]} : vector<96x64xf32> to vector<32x64xf32>
    %cst_14 = arith.constant dense<0.000000e+00> : vector<128x64xf32>
    %36 = tpu.matmul %34, %35, %cst_14 {dimension_numbers = #tpu.dot_dimension_numbers<[1], [0], [0], [1], [0, 0, 1, 1], [], []>} : vector<128x32xf32>, vector<32x64xf32>, vector<128x64xf32> -> vector<128x64xf32>
    %37 = vector.extract_strided_slice %31 {offsets = [0, 0, 0], sizes = [8, 16, 32], strides = [1, 1, 1]} : vector<8x24x32xf32> to vector<8x16x32xf32>
    %38 = vector.shape_cast %37 : vector<8x16x32xf32> to vector<128x32xf32>
    %39 = vector.extract_strided_slice %32 {offsets = [32, 0], sizes = [32, 64], strides = [1, 1]} : vector<96x64xf32> to vector<32x64xf32>
    %cst_15 = arith.constant dense<0.000000e+00> : vector<128x64xf32>
    %40 = tpu.matmul %38, %39, %cst_15 {dimension_numbers = #tpu.dot_dimension_numbers<[1], [0], [0], [1], [0, 0, 1, 1], [], []>} : vector<128x32xf32>, vector<32x64xf32>, vector<128x64xf32> -> vector<128x64xf32>
    %41 = arith.addf %36, %40 : vector<128x64xf32>
    %42 = vector.extract_strided_slice %16 {offsets = [0, 1, 0], sizes = [8, 16, 32], strides = [1, 1, 1]} : vector<8x24x32xf32> to vector<8x16x32xf32>
    %43 = vector.shape_cast %42 : vector<8x16x32xf32> to vector<128x32xf32>
    %44 = vector.extract_strided_slice %32 {offsets = [64, 0], sizes = [32, 64], strides = [1, 1]} : vector<96x64xf32> to vector<32x64xf32>
    %cst_16 = arith.constant dense<0.000000e+00> : vector<128x64xf32>
    %45 = tpu.matmul %43, %44, %cst_16 {dimension_numbers = #tpu.dot_dimension_numbers<[1], [0], [0], [1], [0, 0, 1, 1], [], []>} : vector<128x32xf32>, vector<32x64xf32>, vector<128x64xf32> -> vector<128x64xf32>
    %46 = arith.addf %41, %45 : vector<128x64xf32>
    %c0_17 = arith.constant 0 : index
    %c0_18 = arith.constant 0 : index
    %47 = vector.load %arg6[%c0_17, %c0_18] : memref<3x64xf32, #tpu.memory_space<vmem>>, vector<3x64xf32>
    %48 = vector.extract_strided_slice %47 {offsets = [0, 0], sizes = [1, 64], strides = [1, 1]} : vector<3x64xf32> to vector<1x64xf32>
    %49 = vector.broadcast %48 : vector<1x64xf32> to vector<128x64xf32>
    %50 = arith.addf %46, %49 : vector<128x64xf32>
    %cst_19 = arith.constant 0.000000e+00 : f32
    %51 = vector.broadcast %cst_19 : f32 to vector<128x64xf32>
    %52 = arith.maximumf %50, %51 : vector<128x64xf32>
    %53 = vector.extract_strided_slice %47 {offsets = [1, 0], sizes = [1, 64], strides = [1, 1]} : vector<3x64xf32> to vector<1x64xf32>
    %54 = vector.broadcast %53 : vector<1x64xf32> to vector<128x64xf32>
    %55 = arith.mulf %52, %54 : vector<128x64xf32>
    %56 = vector.extract_strided_slice %47 {offsets = [2, 0], sizes = [1, 64], strides = [1, 1]} : vector<3x64xf32> to vector<1x64xf32>
    %57 = vector.broadcast %56 : vector<1x64xf32> to vector<128x64xf32>
    %58 = arith.addf %55, %57 : vector<128x64xf32>
    %c0_20 = arith.constant 0 : index
    %c0_21 = arith.constant 0 : index
    %59 = vector.load %arg14[%c0_20, %c0_21] : memref<136x64xf32, #tpu.memory_space<vmem>>, vector<128x64xf32>
    tpu.vector_store %arg14[%c0_20, %c0_21], %58 {strides = array<i32>} : memref<136x64xf32, #tpu.memory_space<vmem>>, vector<128x64xf32>,
    %cst_22 = arith.constant 0.000000e+00 : f32
    %60 = vector.broadcast %cst_22 : f32 to vector<8x64xf32>
    %c128 = arith.constant 128 : index
    %c0_23 = arith.constant 0 : index
    %61 = vector.load %arg14[%c128, %c0_23] : memref<136x64xf32, #tpu.memory_space<vmem>>, vector<8x64xf32>
    tpu.vector_store %arg14[%c128, %c0_23], %60 {strides = array<i32>} : memref<136x64xf32, #tpu.memory_space<vmem>>, vector<8x64xf32>,
    %c0_24 = arith.constant 0 : index
    %c0_25 = arith.constant 0 : index
    %62 = vector.load %arg7[%c0_24, %c0_25] : memref<192x32xf32, #tpu.memory_space<vmem>>, vector<192x32xf32>
    %c0_26 = arith.constant 0 : index
    %c0_27 = arith.constant 0 : index
    %63 = vector.load %arg14[%c0_26, %c0_27] : memref<136x64xf32, #tpu.memory_space<vmem>>, vector<128x64xf32>
    %64 = vector.extract_strided_slice %62 {offsets = [0, 0], sizes = [64, 32], strides = [1, 1]} : vector<192x32xf32> to vector<64x32xf32>
    %cst_28 = arith.constant dense<0.000000e+00> : vector<128x32xf32>
    %65 = tpu.matmul %63, %64, %cst_28 {dimension_numbers = #tpu.dot_dimension_numbers<[1], [0], [0], [1], [0, 0, 1, 1], [], []>} : vector<128x64xf32>, vector<64x32xf32>, vector<128x32xf32> -> vector<128x32xf32>
    %c1 = arith.constant 1 : index
    %c0_29 = arith.constant 0 : index
    %66 = vector.load %arg14[%c1, %c0_29] : memref<136x64xf32, #tpu.memory_space<vmem>>, vector<128x64xf32>
    %67 = vector.extract_strided_slice %62 {offsets = [64, 0], sizes = [64, 32], strides = [1, 1]} : vector<192x32xf32> to vector<64x32xf32>
    %cst_30 = arith.constant dense<0.000000e+00> : vector<128x32xf32>
    %68 = tpu.matmul %66, %67, %cst_30 {dimension_numbers = #tpu.dot_dimension_numbers<[1], [0], [0], [1], [0, 0, 1, 1], [], []>} : vector<128x64xf32>, vector<64x32xf32>, vector<128x32xf32> -> vector<128x32xf32>
    %69 = arith.addf %65, %68 : vector<128x32xf32>
    %c2 = arith.constant 2 : index
    %c0_31 = arith.constant 0 : index
    %70 = vector.load %arg14[%c2, %c0_31] : memref<136x64xf32, #tpu.memory_space<vmem>>, vector<128x64xf32>
    %71 = vector.extract_strided_slice %62 {offsets = [128, 0], sizes = [64, 32], strides = [1, 1]} : vector<192x32xf32> to vector<64x32xf32>
    %cst_32 = arith.constant dense<0.000000e+00> : vector<128x32xf32>
    %72 = tpu.matmul %70, %71, %cst_32 {dimension_numbers = #tpu.dot_dimension_numbers<[1], [0], [0], [1], [0, 0, 1, 1], [], []>} : vector<128x64xf32>, vector<64x32xf32>, vector<128x32xf32> -> vector<128x32xf32>
    %73 = arith.addf %69, %72 : vector<128x32xf32>
    %c0_33 = arith.constant 0 : index
    %c0_34 = arith.constant 0 : index
    %74 = vector.load %arg8[%c0_33, %c0_34] : memref<3x32xf32, #tpu.memory_space<vmem>>, vector<3x32xf32>
    %75 = vector.extract_strided_slice %74 {offsets = [0, 0], sizes = [1, 32], strides = [1, 1]} : vector<3x32xf32> to vector<1x32xf32>
    %76 = vector.broadcast %75 : vector<1x32xf32> to vector<128x32xf32>
    %77 = arith.addf %73, %76 : vector<128x32xf32>
    %cst_35 = arith.constant 0.000000e+00 : f32
    %78 = vector.broadcast %cst_35 : f32 to vector<128x32xf32>
    %79 = arith.maximumf %77, %78 : vector<128x32xf32>
    %80 = vector.extract_strided_slice %74 {offsets = [1, 0], sizes = [1, 32], strides = [1, 1]} : vector<3x32xf32> to vector<1x32xf32>
    %81 = vector.broadcast %80 : vector<1x32xf32> to vector<128x32xf32>
    %82 = arith.mulf %79, %81 : vector<128x32xf32>
    %83 = vector.extract_strided_slice %74 {offsets = [2, 0], sizes = [1, 32], strides = [1, 1]} : vector<3x32xf32> to vector<1x32xf32>
    %84 = vector.broadcast %83 : vector<1x32xf32> to vector<128x32xf32>
    %85 = arith.addf %82, %84 : vector<128x32xf32>
    %c0_36 = arith.constant 0 : index
    %c0_37 = arith.constant 0 : index
    %86 = vector.load %arg15[%c0_36, %c0_37] : memref<136x32xf32, #tpu.memory_space<vmem>>, vector<128x32xf32>
    tpu.vector_store %arg15[%c0_36, %c0_37], %85 {strides = array<i32>} : memref<136x32xf32, #tpu.memory_space<vmem>>, vector<128x32xf32>,
    %cst_38 = arith.constant 0.000000e+00 : f32
    %87 = vector.broadcast %cst_38 : f32 to vector<8x32xf32>
    %c128_39 = arith.constant 128 : index
    %c0_40 = arith.constant 0 : index
    %88 = vector.load %arg15[%c128_39, %c0_40] : memref<136x32xf32, #tpu.memory_space<vmem>>, vector<8x32xf32>
    tpu.vector_store %arg15[%c128_39, %c0_40], %87 {strides = array<i32>} : memref<136x32xf32, #tpu.memory_space<vmem>>, vector<8x32xf32>,
    %c0_41 = arith.constant 0 : index
    %c0_42 = arith.constant 0 : index
    %89 = vector.load %arg9[%c0_41, %c0_42] : memref<96x32xf32, #tpu.memory_space<vmem>>, vector<96x32xf32>
    %c0_43 = arith.constant 0 : index
    %c0_44 = arith.constant 0 : index
    %90 = vector.load %arg15[%c0_43, %c0_44] : memref<136x32xf32, #tpu.memory_space<vmem>>, vector<128x32xf32>
    %91 = vector.extract_strided_slice %89 {offsets = [0, 0], sizes = [32, 32], strides = [1, 1]} : vector<96x32xf32> to vector<32x32xf32>
    %cst_45 = arith.constant dense<0.000000e+00> : vector<128x32xf32>
    %92 = tpu.matmul %90, %91, %cst_45 {dimension_numbers = #tpu.dot_dimension_numbers<[1], [0], [0], [1], [0, 0, 1, 1], [], []>} : vector<128x32xf32>, vector<32x32xf32>, vector<128x32xf32> -> vector<128x32xf32>
    %c1_46 = arith.constant 1 : index
    %c0_47 = arith.constant 0 : index
    %93 = vector.load %arg15[%c1_46, %c0_47] : memref<136x32xf32, #tpu.memory_space<vmem>>, vector<128x32xf32>
    %94 = vector.extract_strided_slice %89 {offsets = [32, 0], sizes = [32, 32], strides = [1, 1]} : vector<96x32xf32> to vector<32x32xf32>
    %cst_48 = arith.constant dense<0.000000e+00> : vector<128x32xf32>
    %95 = tpu.matmul %93, %94, %cst_48 {dimension_numbers = #tpu.dot_dimension_numbers<[1], [0], [0], [1], [0, 0, 1, 1], [], []>} : vector<128x32xf32>, vector<32x32xf32>, vector<128x32xf32> -> vector<128x32xf32>
    %96 = arith.addf %92, %95 : vector<128x32xf32>
    %c2_49 = arith.constant 2 : index
    %c0_50 = arith.constant 0 : index
    %97 = vector.load %arg15[%c2_49, %c0_50] : memref<136x32xf32, #tpu.memory_space<vmem>>, vector<128x32xf32>
    %98 = vector.extract_strided_slice %89 {offsets = [64, 0], sizes = [32, 32], strides = [1, 1]} : vector<96x32xf32> to vector<32x32xf32>
    %cst_51 = arith.constant dense<0.000000e+00> : vector<128x32xf32>
    %99 = tpu.matmul %97, %98, %cst_51 {dimension_numbers = #tpu.dot_dimension_numbers<[1], [0], [0], [1], [0, 0, 1, 1], [], []>} : vector<128x32xf32>, vector<32x32xf32>, vector<128x32xf32> -> vector<128x32xf32>
    %100 = arith.addf %96, %99 : vector<128x32xf32>
    %c0_52 = arith.constant 0 : index
    %c0_53 = arith.constant 0 : index
    %101 = vector.load %arg10[%c0_52, %c0_53] : memref<3x32xf32, #tpu.memory_space<vmem>>, vector<3x32xf32>
    %102 = vector.extract_strided_slice %101 {offsets = [0, 0], sizes = [1, 32], strides = [1, 1]} : vector<3x32xf32> to vector<1x32xf32>
    %103 = vector.broadcast %102 : vector<1x32xf32> to vector<128x32xf32>
    %104 = arith.addf %100, %103 : vector<128x32xf32>
    %cst_54 = arith.constant 0.000000e+00 : f32
    %105 = vector.broadcast %cst_54 : f32 to vector<128x32xf32>
    %106 = arith.maximumf %104, %105 : vector<128x32xf32>
    %107 = vector.extract_strided_slice %101 {offsets = [1, 0], sizes = [1, 32], strides = [1, 1]} : vector<3x32xf32> to vector<1x32xf32>
    %108 = vector.broadcast %107 : vector<1x32xf32> to vector<128x32xf32>
    %109 = arith.mulf %106, %108 : vector<128x32xf32>
    %110 = vector.extract_strided_slice %101 {offsets = [2, 0], sizes = [1, 32], strides = [1, 1]} : vector<3x32xf32> to vector<1x32xf32>
    %111 = vector.broadcast %110 : vector<1x32xf32> to vector<128x32xf32>
    %112 = arith.addf %109, %111 : vector<128x32xf32>
    %c0_55 = arith.constant 0 : index
    %c0_56 = arith.constant 0 : index
    %113 = vector.load %arg11[%c0_55, %c0_56] : memref<32x32xf32, #tpu.memory_space<vmem>>, vector<32x32xf32>
    %cst_57 = arith.constant dense<0.000000e+00> : vector<128x32xf32>
    %114 = tpu.matmul %112, %113, %cst_57 {dimension_numbers = #tpu.dot_dimension_numbers<[1], [0], [0], [1], [0, 0, 1, 1], [], []>} : vector<128x32xf32>, vector<32x32xf32>, vector<128x32xf32> -> vector<128x32xf32>
    %c0_58 = arith.constant 0 : index
    %c0_59 = arith.constant 0 : index
    %115 = vector.load %arg12[%c0_58, %c0_59] : memref<3x32xf32, #tpu.memory_space<vmem>>, vector<3x32xf32>
    %116 = vector.extract_strided_slice %115 {offsets = [0, 0], sizes = [1, 32], strides = [1, 1]} : vector<3x32xf32> to vector<1x32xf32>
    %117 = vector.broadcast %116 : vector<1x32xf32> to vector<128x32xf32>
    %118 = arith.addf %114, %117 : vector<128x32xf32>
    %cst_60 = arith.constant 0.000000e+00 : f32
    %119 = vector.broadcast %cst_60 : f32 to vector<128x32xf32>
    %120 = arith.maximumf %118, %119 : vector<128x32xf32>
    %121 = vector.extract_strided_slice %115 {offsets = [1, 0], sizes = [1, 32], strides = [1, 1]} : vector<3x32xf32> to vector<1x32xf32>
    %122 = vector.broadcast %121 : vector<1x32xf32> to vector<128x32xf32>
    %123 = arith.mulf %120, %122 : vector<128x32xf32>
    %124 = vector.extract_strided_slice %115 {offsets = [2, 0], sizes = [1, 32], strides = [1, 1]} : vector<3x32xf32> to vector<1x32xf32>
    %125 = vector.broadcast %124 : vector<1x32xf32> to vector<128x32xf32>
    %126 = arith.addf %123, %125 : vector<128x32xf32>
    %127 = vector.shape_cast %126 : vector<128x32xf32> to vector<8x16x32xf32>
    %128 = tpu.iota {dimensions = array<i32: 1>} : vector<8x16x32xi32>
    %c9_i32 = arith.constant 9 : i32
    %129 = vector.broadcast %c9_i32 : i32 to vector<8x16x32xi32>
    %130 = arith.cmpi slt, %128, %129 : vector<8x16x32xi32>
    %cst_61 = arith.constant 0xFF800000 : f32
    %131 = vector.broadcast %cst_61 : f32 to vector<8x16x32xf32>
    %132 = arith.select %130, %127, %131 : vector<8x16x32xi1>, vector<8x16x32xf32>
    %cst_62 = arith.constant dense<0xFF800000> : vector<8x32xf32>
    %133 = vector.multi_reduction <maximumf>, %132, %cst_62 [1] : vector<8x16x32xf32> to vector<8x32xf32>
    %c0_63 = arith.constant 0 : index
    %c0_64 = arith.constant 0 : index
    %134 = vector.load %arg13[%c0_63, %c0_64] : memref<8x32xf32, #tpu.memory_space<vmem>>, vector<8x32xf32>
    tpu.vector_store %arg13[%c0_63, %c0_64], %133 {strides = array<i32>} : memref<8x32xf32, #tpu.memory_space<vmem>>, vector<8x32xf32>,
    return
  }
  func.func @transform_0(%arg0: i32) -> (i32, i32, i32) {
    %c0_i32 = arith.constant 0 : i32
    %c0_i32_0 = arith.constant 0 : i32
    %c0_i32_1 = arith.constant 0 : i32
    return %arg0, %c0_i32, %c0_i32_0 : i32, i32, i32
  }
  func.func @transform_1(%arg0: i32) -> (i32, i32, i32) {
    %c0_i32 = arith.constant 0 : i32
    %c0_i32_0 = arith.constant 0 : i32
    %c0_i32_1 = arith.constant 0 : i32
    return %arg0, %c0_i32, %c0_i32_0 : i32, i32, i32
  }
  func.func @transform_2(%arg0: i32) -> (i32, i32) {
    %c0_i32 = arith.constant 0 : i32
    %c0_i32_0 = arith.constant 0 : i32
    %c0_i32_1 = arith.constant 0 : i32
    return %c0_i32, %c0_i32_0 : i32, i32
  }
  func.func @transform_3(%arg0: i32) -> (i32, i32) {
    %c0_i32 = arith.constant 0 : i32
    %c0_i32_0 = arith.constant 0 : i32
    %c0_i32_1 = arith.constant 0 : i32
    return %c0_i32, %c0_i32_0 : i32, i32
  }
  func.func @transform_4(%arg0: i32) -> (i32, i32) {
    %c0_i32 = arith.constant 0 : i32
    %c0_i32_0 = arith.constant 0 : i32
    %c0_i32_1 = arith.constant 0 : i32
    return %c0_i32, %c0_i32_0 : i32, i32
  }
  func.func @transform_5(%arg0: i32) -> (i32, i32) {
    %c0_i32 = arith.constant 0 : i32
    %c0_i32_0 = arith.constant 0 : i32
    %c0_i32_1 = arith.constant 0 : i32
    return %c0_i32, %c0_i32_0 : i32, i32
  }
  func.func @transform_6(%arg0: i32) -> (i32, i32) {
    %c0_i32 = arith.constant 0 : i32
    %c0_i32_0 = arith.constant 0 : i32
    %c0_i32_1 = arith.constant 0 : i32
    return %c0_i32, %c0_i32_0 : i32, i32
  }
  func.func @transform_7(%arg0: i32) -> (i32, i32) {
    %c0_i32 = arith.constant 0 : i32
    %c0_i32_0 = arith.constant 0 : i32
    %c0_i32_1 = arith.constant 0 : i32
    return %c0_i32, %c0_i32_0 : i32, i32
  }
  func.func @transform_8(%arg0: i32) -> (i32, i32) {
    %c0_i32 = arith.constant 0 : i32
    %c0_i32_0 = arith.constant 0 : i32
    %c0_i32_1 = arith.constant 0 : i32
    return %c0_i32, %c0_i32_0 : i32, i32
  }
  func.func @transform_9(%arg0: i32) -> (i32, i32) {
    %c0_i32 = arith.constant 0 : i32
    %c0_i32_0 = arith.constant 0 : i32
    %c0_i32_1 = arith.constant 0 : i32
    return %c0_i32, %c0_i32_0 : i32, i32
  }
  func.func @transform_10(%arg0: i32) -> (i32, i32) {
    %c0_i32 = arith.constant 0 : i32
    %c0_i32_0 = arith.constant 0 : i32
    %c0_i32_1 = arith.constant 0 : i32
    return %c0_i32, %c0_i32_0 : i32, i32
  }
  func.func @transform_11(%arg0: i32) -> (i32, i32) {
    %c0_i32 = arith.constant 0 : i32
    %c0_i32_0 = arith.constant 0 : i32
    %c0_i32_1 = arith.constant 0 : i32
    return %c0_i32, %c0_i32_0 : i32, i32
  }
  func.func @transform_12(%arg0: i32) -> (i32, i32) {
    %c0_i32 = arith.constant 0 : i32
    %c0_i32_0 = arith.constant 0 : i32
    return %arg0, %c0_i32 : i32, i32
  }
}

module attributes {stable_mosaic.version = 11 : i64} {
  func.func @_aggregate_kernel(%arg0: i32, %arg1: memref<1x4x2xf32, #tpu.memory_space<vmem>>, %arg2: memref<1x2x4xf32, #tpu.memory_space<vmem>>, %arg3: memref<1x4x1xf32, #tpu.memory_space<vmem>>, %arg4: memref<1x4x32xf32, #tpu.memory_space<vmem>>, %arg5: memref<1x1x32xf32, #tpu.memory_space<vmem>>) attributes {dimension_semantics = [#tpu.dimension_semantics<parallel>], iteration_bounds = array<i64: 2>, scalar_prefetch = 0 : i64, scratch_operands = 0 : i64, tpu.core_type = #tpu.core_type<tc>, window_params = [{transform_indices = @transform_0, window_bounds = array<i64: 1, 4, 2>}, {transform_indices = @transform_1, window_bounds = array<i64: 1, 2, 4>}, {transform_indices = @transform_2, window_bounds = array<i64: 1, 4, 1>}, {transform_indices = @transform_3, window_bounds = array<i64: 1, 4, 32>}, {transform_indices = @transform_4, window_bounds = array<i64: 1, 1, 32>}]} {
    %c0 = arith.constant 0 : index
    %c0_0 = arith.constant 0 : index
    %c0_1 = arith.constant 0 : index
    %0 = vector.load %arg1[%c0, %c0_0, %c0_1] : memref<1x4x2xf32, #tpu.memory_space<vmem>>, vector<1x4x2xf32>
    %1 = vector.shape_cast %0 : vector<1x4x2xf32> to vector<4x2xf32>
    %c0_2 = arith.constant 0 : index
    %c0_3 = arith.constant 0 : index
    %c0_4 = arith.constant 0 : index
    %2 = vector.load %arg2[%c0_2, %c0_3, %c0_4] : memref<1x2x4xf32, #tpu.memory_space<vmem>>, vector<1x2x4xf32>
    %3 = vector.shape_cast %2 : vector<1x2x4xf32> to vector<2x4xf32>
    %c0_5 = arith.constant 0 : index
    %c0_6 = arith.constant 0 : index
    %c0_7 = arith.constant 0 : index
    %4 = vector.load %arg4[%c0_5, %c0_6, %c0_7] : memref<1x4x32xf32, #tpu.memory_space<vmem>>, vector<1x4x32xf32>
    %5 = vector.shape_cast %4 : vector<1x4x32xf32> to vector<4x32xf32>
    %c0_8 = arith.constant 0 : index
    %c0_9 = arith.constant 0 : index
    %c0_10 = arith.constant 0 : index
    %6 = vector.load %arg3[%c0_8, %c0_9, %c0_10] : memref<1x4x1xf32, #tpu.memory_space<vmem>>, vector<1x4x1xf32>
    %7 = vector.shape_cast %6 : vector<1x4x1xf32> to vector<4x1xf32>
    %cst = arith.constant dense<0.000000e+00> : vector<4x4xf32>
    %8 = tpu.matmul %1, %3, %cst {dimension_numbers = #tpu.dot_dimension_numbers<[1], [0], [0], [1], [0, 0, 1, 1], [], []>} : vector<4x2xf32>, vector<2x4xf32>, vector<4x4xf32> -> vector<4x4xf32>
    %9 = arith.mulf %1, %1 : vector<4x2xf32>
    %cst_11 = arith.constant dense<0.000000e+00> : vector<4xf32>
    %10 = vector.multi_reduction <add>, %9, %cst_11 [1] : vector<4x2xf32> to vector<4xf32>
    %11 = vector.shape_cast %10 : vector<4xf32> to vector<4x1xf32>
    %12 = arith.mulf %3, %3 : vector<2x4xf32>
    %cst_12 = arith.constant dense<0.000000e+00> : vector<4xf32>
    %13 = vector.multi_reduction <add>, %12, %cst_12 [0] : vector<2x4xf32> to vector<4xf32>
    %14 = vector.shape_cast %13 : vector<4xf32> to vector<1x4xf32>
    %15 = vector.broadcast %11 : vector<4x1xf32> to vector<4x4xf32>
    %16 = vector.broadcast %14 : vector<1x4xf32> to vector<4x4xf32>
    %17 = arith.addf %15, %16 : vector<4x4xf32>
    %cst_13 = arith.constant 2.000000e+00 : f32
    %18 = vector.broadcast %cst_13 : f32 to vector<4x4xf32>
    %19 = arith.mulf %18, %8 : vector<4x4xf32>
    %20 = arith.subf %17, %19 : vector<4x4xf32>
    %cst_14 = arith.constant 0.000000e+00 : f32
    %21 = vector.broadcast %cst_14 : f32 to vector<4x4xf32>
    %22 = arith.maximumf %20, %21 : vector<4x4xf32>
    %cst_15 = arith.constant -2.000000e+00 : f32
    %23 = vector.broadcast %cst_15 : f32 to vector<4x4xf32>
    %24 = arith.mulf %23, %22 : vector<4x4xf32>
    %25 = math.exp %24 : vector<4x4xf32>
    %cst_16 = arith.constant dense<0.000000e+00> : vector<4xf32>
    %26 = vector.multi_reduction <add>, %25, %cst_16 [1] : vector<4x4xf32> to vector<4xf32>
    %27 = vector.shape_cast %26 : vector<4xf32> to vector<4x1xf32>
    %cst_17 = arith.constant 0.797884583 : f32
    %28 = vector.broadcast %cst_17 : f32 to vector<4x1xf32>
    %29 = arith.mulf %28, %27 : vector<4x1xf32>
    %30 = arith.mulf %29, %7 : vector<4x1xf32>
    %31 = vector.broadcast %30 : vector<4x1xf32> to vector<4x32xf32>
    %32 = arith.mulf %31, %5 : vector<4x32xf32>
    %cst_18 = arith.constant dense<0.000000e+00> : vector<32xf32>
    %33 = vector.multi_reduction <add>, %32, %cst_18 [0] : vector<4x32xf32> to vector<32xf32>
    %34 = vector.shape_cast %33 : vector<32xf32> to vector<1x32xf32>
    %c0_19 = arith.constant 0 : index
    %c0_20 = arith.constant 0 : index
    %c0_21 = arith.constant 0 : index
    %35 = vector.load %arg5[%c0_19, %c0_20, %c0_21] : memref<1x1x32xf32, #tpu.memory_space<vmem>>, vector<1x1x32xf32>
    %36 = vector.shape_cast %35 : vector<1x1x32xf32> to vector<1x32xf32>
    %37 = vector.shape_cast %34 : vector<1x32xf32> to vector<1x1x32xf32>
    tpu.vector_store %arg5[%c0_19, %c0_20, %c0_21], %37 {strides = array<i32>} : memref<1x1x32xf32, #tpu.memory_space<vmem>>, vector<1x1x32xf32>,
    return
  }
  func.func @transform_0(%arg0: i32) -> (i32, i32, i32) {
    %c0_i32 = arith.constant 0 : i32
    %c0_i32_0 = arith.constant 0 : i32
    %c0_i32_1 = arith.constant 0 : i32
    return %arg0, %c0_i32, %c0_i32_0 : i32, i32, i32
  }
  func.func @transform_1(%arg0: i32) -> (i32, i32, i32) {
    %c0_i32 = arith.constant 0 : i32
    %c0_i32_0 = arith.constant 0 : i32
    %c0_i32_1 = arith.constant 0 : i32
    return %arg0, %c0_i32, %c0_i32_0 : i32, i32, i32
  }
  func.func @transform_2(%arg0: i32) -> (i32, i32, i32) {
    %c0_i32 = arith.constant 0 : i32
    %c0_i32_0 = arith.constant 0 : i32
    %c0_i32_1 = arith.constant 0 : i32
    return %arg0, %c0_i32, %c0_i32_0 : i32, i32, i32
  }
  func.func @transform_3(%arg0: i32) -> (i32, i32, i32) {
    %c0_i32 = arith.constant 0 : i32
    %c0_i32_0 = arith.constant 0 : i32
    %c0_i32_1 = arith.constant 0 : i32
    return %arg0, %c0_i32, %c0_i32_0 : i32, i32, i32
  }
  func.func @transform_4(%arg0: i32) -> (i32, i32, i32) {
    %c0_i32 = arith.constant 0 : i32
    %c0_i32_0 = arith.constant 0 : i32
    %c0_i32_1 = arith.constant 0 : i32
    return %arg0, %c0_i32, %c0_i32_0 : i32, i32, i32
  }
}

</mosaic_0001>

<bundles_post_ra>
// kernel: structured_embedding_net.3
= control target key start
LH: loop header
LB: loop body
LE: loop exit
PB: predicated region body
PF: predicated region fallthrough
CT: control target
= control target key end

     0   :  { %9 = vsyncpa [#allocation3], 0  ;;  %s745_s0 = inlined_call_operand.vmem [shape: f32[2,4,2], index: 0, kind: input, shape index: {}]   ;;  %s746_s1 = inlined_call_operand.vmem [shape: f32[2,2,4], index: 1, kind: input, shape index: {}]   ;;  %s747_s2 = inlined_call_operand.vmem [shape: f32[2,4,1], index: 2, kind: input, shape index: {}]   ;;  %s748_s3 = inlined_call_operand.vmem [shape: f32[2,4,32], index: 3, kind: input, shape index: {}]   ;;  %s749_s4 = inlined_call_operand.hbm [shape: f32[2,1,32], index: 4, kind: output, shape index: {}]  }
   0x1   :  { %11 = vsyncpa [#allocation3 + $0x1], 0  ;;  %s631_s15 = smov 0   ;;  %s633_s16 = smov 0  }
   0x2   :  { %s635_s17 = smov 0   ;;  %s637_s18 = smov 0  }
   0x3 LB: > { %s652_s19 = sadd.s32 4294967295, %s600_s18   ;;  %s472_s20 = sadd.s32 4294967294, %s600_s18   ;;  %s600_s18 = sphi %s637_s18, %s755_s18   ;;  %s596_s17 = sphi %s635_s17, %s754_s17   ;;  %s592_s16 = sphi %s633_s16, %s753_s16   ;;  %s588_s15 = sphi %s631_s15, %s752_s15  }
   0x4   : > { %s656_s21 = sadd.s32 1, %s600_s18   ;;  %s128_s22 = sadd.s32 1, %s596_s17 }
   0x5   : > { %s125_s23 = ssub.s32 %s600_s18, %s656_s21  ;;  %p138_p0 = scmp.ne.s32.totalorder %s596_s17, %s592_s16 }
   0x6   : > { %p126_p1 = scmp.eq.s32.totalorder %s125_s23, 0  ;;  %p139_p2 = scmp.eq.s32.totalorder %s652_s19, 1 }
   0x7   : > { %p144_p3 = scmp.ne.s32.totalorder %s592_s16, %s588_s15  ;;  %p145_p4 = scmp.eq.s32.totalorder %s472_s20, 1 }
   0x8   : > { %s667_s24 = scalar_select %p126_p1, %s596_s17, %s128_s22  }
   0x9   : > { %p669_p5 = por %p139_p2, %p138_p0  ;;  %p673_p6 = por %p145_p4, %p144_p3 }
   0xa   : > { %p475_p7 = scmp.ge.s32.totalorder %s600_s18, 1  ;;  %p191_p8 = scmp.lt.s32.totalorder %s600_s18, 3 }
   0xc   : > { %p192_p9 = pnand %p475_p7, %p191_p8 }
   0xd   : > { %p227_p10 = scmp.lt.s32.totalorder (!%p192_p9), %s652_s19, 1  ;;  %v602_v0 = vmov (!%p192_p9), 0.0   ;;  %vm603_vm0 = vmmov (!%p192_p9), 0   ;;  %vm251_vm1 = vcmask (!%p192_p9), 1041408   ;;  %vm247_vm2 = vcmask (!%p192_p9), 15360   ;;  %s225_s22 = sand.u32 (!%p192_p9), 1, %s592_s16  }
   0xe   : > { %195 = sbr.rel (%p192_p9) target bundleno = 564 (0x234), region = 36  ;;  %487 = vmatprep.subr.mxu0 (!%p192_p9), %v602_v0  ;;  %489 = vmatprep.mubr.msk.f32.mxu0 (!%p192_p9), %vm603_vm0, %v602_v0  ;;  %vm326_vm3 = vcmask (!%p192_p9), 11264   ;;  %vm331_vm4 = vcmask (!%p192_p9), 25600   ;;  %vm346_vm5 = vcmask (!%p192_p9), 27648   ;;  %v604_v24 = vmov (!%p192_p9), 0   ;;  %s482_s23 = sshll.u32 (!%p192_p9), %s652_s19, 4 }
   0xf   : > { %534 = vset.pattern.permute.xlu1 (!%p192_p9), %v604_v24  ;;  %535 = vset.pattern.permute.xlu0 (!%p192_p9), %v604_v24  ;;  %vm358_vm6 = vcmask (!%p192_p9), 257024   ;;  %vm366_vm7 = vcmask (!%p192_p9), 253952  }
  0x15   : > { %s228_s27 = scalar_select %p227_p10, %s652_s19, 1 }
  0x16   : > { %s605_s19 = smov [#allocation2]  }
  0x17   : > { %s477_s28 = sshll.u32 %s228_s27, 1  ;;  %s681_s29 = sshll.u32 %s228_s27, 2 }
  0x18   : > { %s234_s6 = scalar_lea.vmem %s746_s1, %s477_s28  ;;  %s230_s9 = scalar_lea.vmem %s745_s0, %s681_s29 }
  0x19   : > { %v244_v1 = vld [vmem:[%s234_s6] sm:$0x3]  ;;  %s238_s12 = scalar_lea.vmem %s747_s2, %s681_s29  ;;  %s242_s20 = scalar_lea.vmem %s748_s3, %s681_s29 }
  0x1a   : > { %v243_v2 = vld [vmem:[%s230_s9] sm:$0xf]  ;;  %488 = vmatpush3.msk.msra.mxu0 %vm251_vm1, %v244_v1  ;;  %v330_v5 = vmul.f32 %v244_v1, %v244_v1  ;;  %s226_s27 = scalar_lea.vmem [#allocation2], %s225_s22  ;;  %s703_s29 = scalar_lea.hbm %s749_s4, %s482_s23 }
  0x1b   : > { %v325_v3 = vmul.f32 %v243_v2, %v243_v2  ;;  %490 = vmatmul.mubr.msk.f32.vlgmr.msra.gmra.mrb[0].mxu0 %vm247_vm2, %v243_v2  ;;  %v246_v26 = vld [vmem:[%s238_s12] sm:$0xf]  ;;  %s381_s28 = sshll.u32 %s226_s27, 4  ;;  %s369_s6 = scalar_lea.sflag [#allocation3], %s225_s22  ;;  %s705_s28 = int_to_ptr.vmem [resolvable:$true] %s381_s28 }
  0x1c   : > { %v332_v6 = vsel %vm331_vm4, %v330_v5, 0.0  ;;  %v245_v29 = vld [vmem:[%s242_s20] sm:$0xf]  ;;  %s538_s7 = scalar_lea.vmem %s705_s28, 16  ;;  %s542_s8 = sshll.u32 %s605_s19, 4  ;;  %s543_s8 = int_to_ptr.vmem [resolvable:$false] %s542_s8 }
  0x1d   : > { %v327_v4 = vsel %vm326_vm3, %v325_v3, 0.0  ;;  %v333_v7 = vrot.slane %v332_v6, 4  ;;  %p539_p11 = scmp.ne.s32.totalorder %s705_s28, %s538_s7  ;;  %s544_s9 = scalar_lea.vmem %s543_s8, 32 }
  0x1e   : > { %328 = vadd.xlane.f32.xlu0 %v327_v4  ;;  %p545_p0 = scmp.lt.s32.totalorder %s705_s28, %s543_s8  ;;  %p546_p1 = scmp.lt.s32.totalorder %s544_s9, %s538_s7 }
  0x1f   : > { %v334_v8 = vadd.f32 %v333_v7, %v332_v6  ;;  %p540_p12 = pnand %p539_p11, %p669_p5 }
  0x20   : > { %p547_p2 = por %p546_p1, %p545_p0 }
  0x21   : > { %v335_v9 = vrot.slane %v334_v8, 2  ;;  %p541_p13 = pneg %p540_p12 }
  0x23   : > { %v336_v10 = vadd.f32 %v335_v9, %v334_v8  ;;  %p548_p3 = pnand %p547_p2, %p541_p13 }
  0x25   : > { %v337_v11 = vrot.slane %v336_v10, 1 }
  0x27   : > { %v338_v12 = vadd.f32 %v337_v11, %v336_v10 }
  0xab   : > { %v329_v13 = vpop.xlane.xlu0 %328 }
  0xac   : > { %v339_v14 = vadd.f32 %v338_v12, %v329_v13 }
  0xee   : > { %v321_v15 = vpop.f32.mrb[0].mxu0 }
  0xef   : > { %v340_v16 = vmul.f32 2.0, %v321_v15  ;;  %v491_v17 = vpop.f32.mrb[1].mxu0 }
  0xf1   : > { %v341_v18 = vsub.f32 %v339_v14, %v340_v16 }
  0xf3   : > { %v342_v19 = vmax.f32 %v341_v18, 0.0 }
  0xf5   : > { %v343_v20 = vmul.f32 -2.0, %v342_v19 }
  0xf7   : > { %v344_v21 = vmul.f32 1.442695, %v343_v20 }
  0xf9   : > { %536 = vpow2.f32 %v344_v21 }
 0x103   : > { %v537_v22 = vpop.eup %536 }
 0x104   : > { %v347_v23 = vsel %vm346_vm5, %v537_v22, 0.0 }
 0x105   : > { %348 = vadd.xlane.f32.xlu0 %v347_v23 }
 0x192   : > { %v349_v25 = vpop.xlane.xlu0 %348 }
 0x193   : > { %v350_v27 = vmul.f32 0.7978846, %v349_v25 }
 0x195   : > { %v351_v28 = vmul.f32 %v350_v27, %v246_v26 }
 0x197   : > { %354 = vperm.xlu1 %534, %v351_v28  }
 0x216   : > { %v355_v30 = vpop.permute.xlu1 %354 }
 0x217   : > { %v357_v31 = vmul.f32 %v355_v30, %v245_v29 }
 0x219   : > { %v359_v32 = vsel %vm358_vm6, %v357_v31, 0.0 }
 0x21a   : > { %v360_v33 = vrot.slane %v359_v32, 4 }
 0x21c   : > { %v361_v34 = vadd.f32 %v360_v33, %v359_v32 }
 0x21e   : > { %v362_v35 = vrot.slane %v361_v34, 2 }
 0x220   : > { %v363_v36 = vadd.f32 %v362_v35, %v361_v34 }
 0x222   : > { %v364_v37 = vrot.slane %v363_v36, 1 }
 0x224   : > { %v365_v38 = vadd.f32 %v364_v37, %v363_v36 }
 0x226   : > { %367 = vst.msk [vmem:[%s226_s27] sm:$0x1] %vm366_vm7, %v365_v38 }
 0x227   : > { %551 = shalt.err (!%p548_p3)
}
 0x228   : > { %s552_s10 = scalar_lea.hbm %s703_s29, 16  ;;  %s556_s13 = scalar_lea.hbm %s749_s4, 32 }
 0x229   : > { %p553_p4 = scmp.ne.s32.totalorder %s703_s29, %s552_s10  ;;  %p557_p9 = scmp.lt.u32.totalorder %s703_s29, %s749_s4 }
 0x22a   : > { %p558_p10 = scmp.lt.u32.totalorder %s556_s13, %s552_s10  ;;  %p560_p12 = scmp.lt.u32.totalorder %s552_s10, %s703_s29 }
 0x22b   : > { %p554_p7 = pnand %p553_p4, %p669_p5 }
 0x22c   : > { %p559_p11 = por %p558_p10, %p557_p9 }
 0x22d   : > { %p555_p8 = pneg %p554_p7 }
 0x22e   : > { %p561_p13 = por %p560_p12, %p559_p11 }
 0x230   : > { %p562_p0 = pnand %p561_p13, %p555_p8 }
 0x232   : > { %565 = shalt.err (!%p562_p0)
}
 0x233   : > { %492 = dma.vmem_to_hbm [thread:$0]  (%p669_p5), %s705_s28, 16, %s703_s29, %s369_s6  }
 0x234 PF: > { %p498_p1 = scmp.ge.s32.totalorder %s600_s18, 2  ;;  %s393_s22 = sand.u32 1, %s588_s15  }
 0x235   : > { %s394_s23 = scalar_lea.sflag [#allocation3], %s393_s22 }
 0x236   : > { %p495_p2 = pnand %p498_p1, %p673_p6 }
 0x238   : > { %583 = dma.done.wait (!%p495_p2), %s394_s23, 16  }
 0x239   : > { %585 = vsyncadd (!%p495_p2), %s394_s23, 4294967280  ;;  %p14_p3 = scmp.ge.s32.totalorder %s656_s21, 4   ;;  %s752_s15 = smov %s592_s16 }
 0x23a   : > { %s753_s16 = smov %s596_s17  ;;  %s754_s17 = smov %s667_s24 }
 0x23b   : > { %s755_s18 = smov %s656_s21  ;;  %16 = sbr.rel (!%p14_p3) target bundleno = 3 (0x3), region = 80 }
 0x242   :  { %398 = vsyncpa [#allocation3], 1 }
 0x243   :  { %400 = vsyncpa [#allocation3 + $0x1], 1 }

// kernel: structured_embedding_net.2
= control target key start
LH: loop header
LB: loop body
LE: loop exit
PB: predicated region body
PF: predicated region fallthrough
CT: control target
= control target key end

     0   :  { %vm145_vm0 = vcmask 1041408   ;;  %vm72_vm1 = vcmask 80896   ;;  %vm4457_vm2 = vmmov 1   ;;  %v68_v61 = vlaneseq  ;;  %s5690_s2 = inlined_call_operand.vmem [shape: f32[10,32], index: 2, kind: input, shape index: {}]   ;;  %s5691_s0 = inlined_call_operand.vmem [shape: f32[8,24,10], index: 0, kind: input, shape index: {}]   ;;  %s5692_s1 = inlined_call_operand.vmem [shape: f32[8,24,10], index: 1, kind: input, shape index: {}]   ;;  %s5693_s4 = inlined_call_operand.vmem [shape: f32[96,64], index: 4, kind: input, shape index: {}]   ;;  %s5694_s3 = inlined_call_operand.vmem [shape: f32[3,32], index: 3, kind: input, shape index: {}]   ;;  %s5695_s6 = inlined_call_operand.vmem [shape: f32[192,32], index: 6, kind: input, shape index: {}]   ;;  %s5696_s8 = inlined_call_operand.vmem [shape: f32[96,32], index: 8, kind: input, shape index: {}]   ;;  %s5697_s5 = inlined_call_operand.vmem [shape: f32[3,64], index: 5, kind: input, shape index: {}]   ;;  %s5698_s10 = inlined_call_operand.vmem [shape: f32[32,32], index: 10, kind: input, shape index: {}]   ;;  %s5699_s7 = inlined_call_operand.vmem [shape: f32[3,32], index: 7, kind: input, shape index: {}]   ;;  %s5700_s9 = inlined_call_operand.vmem [shape: f32[3,32], index: 9, kind: input, shape index: {}]   ;;  %s5701_s11 = inlined_call_operand.vmem [shape: f32[3,32], index: 11, kind: input, shape index: {}]   ;;  %s5702_s12 = inlined_call_operand.vmem [shape: f32[8,32], index: 12, kind: output, shape index: {}]  }
   0x1   :  { %v41_v0 = vld [vmem:[%s5690_s2] sm:$0xff]  ;;  %v42_v1 = vld [vmem:[%s5690_s2 + $0x8] sm:$0x3]  ;;  %vm4530_vm3 = vmpackc.low %vm145_vm0, %vm4457_vm2  ;;  %vm1142_vm4 = vcmask 1046528   ;;  %vm747_vm5 = vcmask 261120   ;;  %vm1453_vm6 = vcmask 523264  }
   0x2   :  { %v4241_v3 = vpack.c.bf16 %v42_v1, %v41_v0  ;;  %v44_v4 = vld [vmem:[%s5691_s0] sm:$0xff]  ;;  %v45_v6 = vld [vmem:[%s5691_s0 + $0x8] sm:$0xff]  ;;  %v46_v8 = vld [vmem:[%s5691_s0 + $0x10] sm:$0xff]  ;;  %v4759_v62 = vshrl.u32 %v68_v61, 7  ;;  %vm3323_vm8 = vcmask 1041409   ;;  %vm3325_vm9 = vcmask 1042434  }
   0x3   :  { %v52_v5 = vld [vmem:[%s5691_s0 + $0x40] sm:$0xff]  ;;  %3821 = vmatprep.mubr.msk.f32.mxu0 %vm72_vm1, %v44_v4  ;;  %v53_v7 = vld [vmem:[%s5691_s0 + $0x48] sm:$0xff]  ;;  %v54_v9 = vld [vmem:[%s5691_s0 + $0x50] sm:$0xff]  ;;  %vm3327_vm10 = vcmask 1043459   ;;  %vm3329_vm11 = vcmask 1044484   ;;  %vm3331_vm12 = vcmask 1045509  }
   0x4   :  { %3833 = vmatprep.mubr.msk.f32.mxu1 %vm72_vm1, %v52_v5  ;;  %4243 = vmatprep.subr.msk.bf16.mxu0 %vm4530_vm3, %v4241_v3  ;;  %v47_v10 = vld [vmem:[%s5691_s0 + $0x18] sm:$0xff]  ;;  %v48_v12 = vld [vmem:[%s5691_s0 + $0x20] sm:$0xff]  ;;  %v49_v14 = vld [vmem:[%s5691_s0 + $0x28] sm:$0xff]  ;;  %v4762_v63 = vsub.s32 0, %v4759_v62  ;;  %v4771_v2 = vsub.s32 1, %v4759_v62  ;;  %vm3333_vm13 = vcmask 1046534  }
   0x5   :  { %4357 = vmatprep.subr.msk.bf16.mxu1 %vm4530_vm3, %v4241_v3  ;;  %4246 = vmatpush3.bf16.msk.msra.mxu0 %vm4530_vm3, %v4241_v3  ;;  %v55_v11 = vld [vmem:[%s5691_s0 + $0x58] sm:$0xff]  ;;  %v56_v13 = vld [vmem:[%s5691_s0 + $0x60] sm:$0xff]  ;;  %v57_v15 = vld [vmem:[%s5691_s0 + $0x68] sm:$0xff]  ;;  %vm3335_vm14 = vcmask 1047559  }
   0x6   :  { %4358 = vmatpush3.bf16.msk.msra.mxu1 %vm4530_vm3, %v4241_v3  ;;  %v50_v16 = vld [vmem:[%s5691_s0 + $0x30] sm:$0xff]  ;;  %v51_v18 = vld [vmem:[%s5691_s0 + $0x38] sm:$0xff]  ;;  %v60_v20 = vld [vmem:[%s5691_s0 + $0x80] sm:$0xff] }
   0x7   :  { %4249 = vmatprep.subr.msk.bf16.mxu1 %vm4530_vm3, %v4241_v3  ;;  %v58_v17 = vld [vmem:[%s5691_s0 + $0x70] sm:$0xff]  ;;  %v59_v19 = vld [vmem:[%s5691_s0 + $0x78] sm:$0xff]  ;;  %v61_v21 = vld [vmem:[%s5691_s0 + $0x88] sm:$0xff] }
   0x8   :  { %3822 = vmatmul.mubr.msk.f32.vlgmr.msra.gmra.mrb[0].mxu0 %vm72_vm1, %v45_v6  ;;  %v62_v22 = vld [vmem:[%s5691_s0 + $0x90] sm:$0xff]  ;;  %v63_v23 = vld [vmem:[%s5691_s0 + $0x98] sm:$0xff]  ;;  %v64_v24 = vld [vmem:[%s5691_s0 + $0xa0] sm:$0xff] }
   0x9   :  { %3834 = vmatmul.mubr.msk.f32.vlgmr.msra.gmra.mrb[0].mxu1 %vm72_vm1, %v53_v7  ;;  %3824 = vmatprep.mubr.msk.f32.mxu0 %vm72_vm1, %v46_v8  ;;  %v65_v25 = vld [vmem:[%s5691_s0 + $0xa8] sm:$0xff]  ;;  %v66_v26 = vld [vmem:[%s5691_s0 + $0xb0] sm:$0xff]  ;;  %v67_v27 = vld [vmem:[%s5691_s0 + $0xb8] sm:$0xff] }
   0xa   :  { %4252 = vmatpush3.bf16.msk.msra.mxu1 %vm4530_vm3, %v4241_v3  ;;  %3836 = vmatprep.mubr.msk.f32.mxu1 %vm72_vm1, %v54_v9  ;;  %v414_v28 = vld [vmem:[%s5692_s1] sm:$0xff]  ;;  %v415_v29 = vld [vmem:[%s5692_s1 + $0x8] sm:$0xff]  ;;  %v416_v30 = vld [vmem:[%s5692_s1 + $0x10] sm:$0xff]  ;;  %v4774_v3 = vsub.s32 2, %v4759_v62 }
   0xb   :  { %v417_v31 = vld [vmem:[%s5692_s1 + $0x18] sm:$0xff]  ;;  %v418_v32 = vld [vmem:[%s5692_s1 + $0x20] sm:$0xff]  ;;  %v419_v33 = vld [vmem:[%s5692_s1 + $0x28] sm:$0xff] }
   0xc   :  { %3825 = vmatmul.mubr.msk.f32.gmra.mrb[2].mxu0 %vm72_vm1, %v47_v10  ;;  %v420_v34 = vld [vmem:[%s5692_s1 + $0x30] sm:$0xff]  ;;  %v421_v35 = vld [vmem:[%s5692_s1 + $0x38] sm:$0xff]  ;;  %v422_v36 = vld [vmem:[%s5692_s1 + $0x40] sm:$0xff] }
   0xd   :  { %3837 = vmatmul.mubr.msk.f32.gmra.mrb[2].mxu1 %vm72_vm1, %v55_v11  ;;  %3827 = vmatprep.mubr.msk.f32.mxu0 %vm72_vm1, %v48_v12  ;;  %v423_v37 = vld [vmem:[%s5692_s1 + $0x48] sm:$0xff]  ;;  %v424_v38 = vld [vmem:[%s5692_s1 + $0x50] sm:$0xff]  ;;  %v425_v39 = vld [vmem:[%s5692_s1 + $0x58] sm:$0xff] }
   0xe   :  { %3839 = vmatprep.mubr.msk.f32.mxu1 %vm72_vm1, %v56_v13  ;;  %v426_v40 = vld [vmem:[%s5692_s1 + $0x60] sm:$0xff]  ;;  %v427_v41 = vld [vmem:[%s5692_s1 + $0x68] sm:$0xff]  ;;  %v428_v42 = vld [vmem:[%s5692_s1 + $0x70] sm:$0xff] }
   0xf   :  { %v429_v43 = vld [vmem:[%s5692_s1 + $0x78] sm:$0xff]  ;;  %v430_v44 = vld [vmem:[%s5692_s1 + $0x80] sm:$0xff]  ;;  %v431_v45 = vld [vmem:[%s5692_s1 + $0x88] sm:$0xff] }
  0x10   :  { %3828 = vmatmul.mubr.msk.f32.gmra.mrb[4].mxu0 %vm72_vm1, %v49_v14  ;;  %v432_v46 = vld [vmem:[%s5692_s1 + $0x90] sm:$0xff]  ;;  %v433_v47 = vld [vmem:[%s5692_s1 + $0x98] sm:$0xff]  ;;  %v434_v48 = vld [vmem:[%s5692_s1 + $0xa0] sm:$0xff] }
  0x11   :  { %3840 = vmatmul.mubr.msk.f32.gmra.mrb[4].mxu1 %vm72_vm1, %v57_v15  ;;  %3830 = vmatprep.mubr.msk.f32.mxu0 %vm72_vm1, %v50_v16  ;;  %v435_v49 = vld [vmem:[%s5692_s1 + $0xa8] sm:$0xff]  ;;  %v436_v50 = vld [vmem:[%s5692_s1 + $0xb0] sm:$0xff]  ;;  %v437_v51 = vld [vmem:[%s5692_s1 + $0xb8] sm:$0xff] }
  0x12   :  { %3842 = vmatprep.mubr.msk.f32.mxu1 %vm72_vm1, %v58_v17  ;;  %v739_v52 = vld [vmem:[%s5693_s4 + $0x20] sm:$0xff]  ;;  %v740_v53 = vld [vmem:[%s5693_s4 + $0x28] sm:$0xff]  ;;  %v741_v55 = vld [vmem:[%s5693_s4 + $0x30] sm:$0xff] }
  0x13   :  { %v4253_v54 = vpack.c.bf16 %v740_v53, %v739_v52  ;;  %v742_v56 = vld [vmem:[%s5693_s4 + $0x38] sm:$0xff]  ;;  %v735_v58 = vld [vmem:[%s5693_s4] sm:$0xff]  ;;  %v736_v59 = vld [vmem:[%s5693_s4 + $0x8] sm:$0xff] }
  0x14   :  { %3831 = vmatmul.mubr.msk.f32.gmra.mrb[6].mxu0 %vm72_vm1, %v51_v18  ;;  %v4257_v57 = vpack.c.bf16 %v742_v56, %v741_v55  ;;  %v4756_v60 = vpack.c.bf16 %v736_v59, %v735_v58  ;;  %v43_v0 = vld [vmem:[%s5694_s3] sm:$0x7] }
  0x15   :  { %3843 = vmatmul.mubr.msk.f32.gmra.mrb[6].mxu1 %vm72_vm1, %v59_v19  ;;  %4254 = vmatprep.subr.bf16.mxu0 %v4253_v54  ;;  %v4768_v1 = vrot.slane %v43_v0, %v4762_v63  ;;  %v4778_v7 = vrot.slane %v43_v0, %v4771_v2  ;;  %v4784_v14 = vrot.slane %v43_v0, %v4774_v3 }
  0x16   :  { %3845 = vmatprep.mubr.msk.f32.mxu1 %vm72_vm1, %v60_v20  ;;  %4256 = vmatpush3.bf16.msra.mxu0 %v4253_v54 }
  0x17   :  { %4258 = vmatprep.subr.bf16.mxu0 %v4257_v57 }
  0x19   :  { %3846 = vmatmul.mubr.msk.f32.gmra.mrb[8].mxu1 %vm72_vm1, %v61_v21 }
  0x1a   :  { %3848 = vmatprep.mubr.msk.f32.mxu1 %vm72_vm1, %v62_v22  ;;  %4260 = vmatpush3.bf16.msra.mxu0 %v4257_v57 }
  0x1b   :  { %4262 = vmatprep.subr.bf16.mxu0 %v4756_v60 }
  0x1d   :  { %3849 = vmatmul.mubr.msk.f32.gmra.mrb[10].mxu1 %vm72_vm1, %v63_v23 }
  0x1e   :  { %3851 = vmatprep.mubr.msk.f32.mxu1 %vm72_vm1, %v64_v24 }
  0x21   :  { %3852 = vmatmul.mubr.msk.f32.gmra.mrb[12].mxu1 %vm72_vm1, %v65_v25 }
  0x22   :  { %3854 = vmatprep.mubr.msk.f32.mxu1 %vm72_vm1, %v66_v26 }
  0x25   :  { %3855 = vmatmul.mubr.msk.f32.gmra.mrb[14].mxu1 %vm72_vm1, %v67_v27 }
  0x26   :  { %3861 = vmatprep.mubr.msk.f32.mxu1 %vm72_vm1, %v414_v28 }
  0x29   :  { %3862 = vmatmul.mubr.msk.f32.vlgmr.msra.gmra.mrb[16].mxu1 %vm72_vm1, %v415_v29 }
  0x2a   :  { %3864 = vmatprep.mubr.msk.f32.mxu1 %vm72_vm1, %v416_v30 }
  0x2d   :  { %3865 = vmatmul.mubr.msk.f32.gmra.mrb[18].mxu1 %vm72_vm1, %v417_v31 }
  0x2e   :  { %3867 = vmatprep.mubr.msk.f32.mxu1 %vm72_vm1, %v418_v32 }
  0x31   :  { %3868 = vmatmul.mubr.msk.f32.gmra.mrb[20].mxu1 %vm72_vm1, %v419_v33 }
  0x32   :  { %3870 = vmatprep.mubr.msk.f32.mxu1 %vm72_vm1, %v420_v34 }
  0x35   :  { %3871 = vmatmul.mubr.msk.f32.gmra.mrb[22].mxu1 %vm72_vm1, %v421_v35 }
  0x36   :  { %3873 = vmatprep.mubr.msk.f32.mxu1 %vm72_vm1, %v422_v36 }
  0x39   :  { %3874 = vmatmul.mubr.msk.f32.gmra.mrb[24].mxu1 %vm72_vm1, %v423_v37 }
  0x3a   :  { %3876 = vmatprep.mubr.msk.f32.mxu1 %vm72_vm1, %v424_v38 }
  0x3d   :  { %3877 = vmatmul.mubr.msk.f32.gmra.mrb[26].mxu1 %vm72_vm1, %v425_v39 }
  0x3e   :  { %3879 = vmatprep.mubr.msk.f32.mxu1 %vm72_vm1, %v426_v40 }
  0x41   :  { %3880 = vmatmul.mubr.msk.f32.gmra.mrb[28].mxu1 %vm72_vm1, %v427_v41 }
  0x42   :  { %3882 = vmatprep.mubr.msk.f32.mxu1 %vm72_vm1, %v428_v42 }
  0x45   :  { %3883 = vmatmul.mubr.msk.f32.gmra.mrb[30].mxu1 %vm72_vm1, %v429_v43 }
  0x46   :  { %3885 = vmatprep.mubr.msk.f32.mxu1 %vm72_vm1, %v430_v44 }
  0x49   :  { %3886 = vmatmul.mubr.msk.f32.gmra.mrb[32].mxu1 %vm72_vm1, %v431_v45 }
  0x4a   :  { %3888 = vmatprep.mubr.msk.f32.mxu1 %vm72_vm1, %v432_v46 }
  0x4d   :  { %3889 = vmatmul.mubr.msk.f32.gmra.mrb[34].mxu1 %vm72_vm1, %v433_v47 }
  0x4e   :  { %3891 = vmatprep.mubr.msk.f32.mxu1 %vm72_vm1, %v434_v48 }
  0x51   :  { %3892 = vmatmul.mubr.msk.f32.gmra.mrb[36].mxu1 %vm72_vm1, %v435_v49 }
  0x52   :  { %3894 = vmatprep.mubr.msk.f32.mxu1 %vm72_vm1, %v436_v50 }
  0x55   :  { %3895 = vmatmul.mubr.msk.f32.gmra.mrb[38].mxu1 %vm72_vm1, %v437_v51 }
  0xdb   :  { %v3823_v5 = vpop.f32.mrb[0].mxu0 }
  0xdc   :  { %v3835_v4 = vpop.f32.mrb[0].mxu1  ;;  %v221_v9 = vadd.f32 %v3823_v5, %v4768_v1  ;;  %v215_v10 = vpop.f32.mrb[1].mxu0 }
  0xdd   :  { %v261_v6 = vadd.f32 %v3835_v4, %v4768_v1  ;;  %v255_v8 = vpop.f32.mrb[1].mxu1  ;;  %v216_v12 = vadd.f32 %v215_v10, %v4768_v1 }
  0xde   :  { %v256_v11 = vadd.f32 %v255_v8, %v4768_v1  ;;  %v335_v15 = vmax.f32 %v221_v9, 0.0 }
  0xdf   :  { %v343_v13 = vmax.f32 %v261_v6, 0.0  ;;  %v334_v18 = vmax.f32 %v216_v12, 0.0  ;;  %v3826_v19 = vpop.f32.mrb[2].mxu0 }
  0xe0   :  { %v342_v16 = vmax.f32 %v256_v11, 0.0  ;;  %v3838_v17 = vpop.f32.mrb[2].mxu1  ;;  %v363_v23 = vmul.f32 %v4778_v7, %v335_v15  ;;  %v231_v24 = vadd.f32 %v3826_v19, %v4768_v1  ;;  %v225_v25 = vpop.f32.mrb[3].mxu0 }
  0xe1   :  { %v371_v20 = vmul.f32 %v4778_v7, %v343_v13  ;;  %v271_v21 = vadd.f32 %v3838_v17, %v4768_v1  ;;  %v265_v22 = vpop.f32.mrb[3].mxu1  ;;  %v362_v28 = vmul.f32 %v4778_v7, %v334_v18  ;;  %v226_v29 = vadd.f32 %v225_v25, %v4768_v1 }
  0xe2   :  { %v370_v26 = vmul.f32 %v4778_v7, %v342_v16  ;;  %v266_v27 = vadd.f32 %v265_v22, %v4768_v1  ;;  %v4798_v32 = vadd.f32 %v4784_v14, %v363_v23  ;;  %v337_v33 = vmax.f32 %v231_v24, 0.0 }
  0xe3   :  { %v4795_v30 = vadd.f32 %v4784_v14, %v371_v20  ;;  %v345_v31 = vmax.f32 %v271_v21, 0.0  ;;  %v336_v37 = vmax.f32 %v226_v29, 0.0  ;;  %v3829_v38 = vpop.f32.mrb[4].mxu0  ;;  %v4806_v41 = vadd.f32 %v4784_v14, %v362_v28 }
  0xe4   :  { %v4801_v34 = vadd.f32 %v4784_v14, %v370_v26  ;;  %v344_v35 = vmax.f32 %v266_v27, 0.0  ;;  %v3841_v36 = vpop.f32.mrb[4].mxu1  ;;  %v365_v42 = vmul.f32 %v4778_v7, %v337_v33  ;;  %v235_v44 = vpop.f32.mrb[5].mxu0  ;;  %v1144_v47 = vrot.slane %v4798_v32, 1 }
  0xe5   :  { %v1158_v39 = vrot.slane %v4795_v30, 1  ;;  %v373_v40 = vmul.f32 %v4778_v7, %v345_v31  ;;  %v275_v43 = vpop.f32.mrb[5].mxu1  ;;  %v281_v48 = vadd.f32 %v3841_v36, %v4768_v1  ;;  %v364_v51 = vmul.f32 %v4778_v7, %v336_v37 }
  0xe6   :  { %v1156_v45 = vrot.slane %v4801_v34, 1  ;;  %v372_v46 = vmul.f32 %v4778_v7, %v344_v35  ;;  %v4817_v50 = vadd.f32 %v4784_v14, %v365_v42  ;;  %v276_v52 = vadd.f32 %v275_v43, %v4768_v1 }
  0xe7   :  { %v4814_v49 = vadd.f32 %v4784_v14, %v373_v40  ;;  %v347_v54 = vmax.f32 %v281_v48, 0.0  ;;  %v241_v55 = vadd.f32 %v3829_v38, %v4768_v1  ;;  %v236_v56 = vadd.f32 %v235_v44, %v4768_v1  ;;  %v3832_v57 = vpop.f32.mrb[6].mxu0 }
  0xe8   :  { %v4822_v53 = vadd.f32 %v4784_v14, %v372_v46  ;;  %v3844_v58 = vpop.f32.mrb[6].mxu1  ;;  %v1143_v61 = vrot.slane %v4806_v41, 1  ;;  %v1148_v0 = vrot.slane %v4817_v50, 1  ;;  %v346_v4 = vmax.f32 %v276_v52, 0.0  ;;  %v245_v6 = vpop.f32.mrb[7].mxu0 }
  0xe9   :  { %v1161_v59 = vrot.slane %v4814_v49, 1  ;;  %v285_v5 = vpop.f32.mrb[7].mxu1  ;;  %v375_v8 = vmul.f32 %v4778_v7, %v347_v54  ;;  %v392_v9 = vadd.f32 %v4784_v14, %v364_v51  ;;  %v339_v10 = vmax.f32 %v241_v55, 0.0 }
  0xea   :  { %v338_v11 = vmax.f32 %v236_v56, 0.0  ;;  %v1159_v12 = vrot.slane %v4822_v53, 1  ;;  %v374_v13 = vmul.f32 %v4778_v7, %v346_v4  ;;  %v251_v15 = vadd.f32 %v3832_v57, %v4768_v1 }
  0xeb   :  { %v291_v16 = vadd.f32 %v3844_v58, %v4768_v1  ;;  %v4836_v17 = vadd.f32 %v4784_v14, %v375_v8  ;;  %v367_v18 = vmul.f32 %v4778_v7, %v339_v10  ;;  %v286_v20 = vadd.f32 %v285_v5, %v4768_v1 }
  0xec   :  { %v366_v19 = vmul.f32 %v4778_v7, %v338_v11  ;;  %v3847_v21 = vpop.f32.mrb[8].mxu1  ;;  %v4842_v22 = vadd.f32 %v4784_v14, %v374_v13  ;;  %v341_v23 = vmax.f32 %v251_v15, 0.0  ;;  %v1146_v28 = vrot.slane %v392_v9, 1 }
  0xed   :  { %v349_v24 = vmax.f32 %v291_v16, 0.0  ;;  %v301_v25 = vadd.f32 %v3847_v21, %v4768_v1  ;;  %v295_v26 = vpop.f32.mrb[9].mxu1  ;;  %v1164_v27 = vrot.slane %v4836_v17, 1  ;;  %v395_v29 = vadd.f32 %v4784_v14, %v367_v18 }
  0xee   :  { %v348_v31 = vmax.f32 %v286_v20, 0.0  ;;  %v4848_v33 = vadd.f32 %v4784_v14, %v366_v19  ;;  %v369_v35 = vmul.f32 %v4778_v7, %v341_v23  ;;  %v1163_v38 = vrot.slane %v4842_v22, 1 }
  0xef   :  { %v377_v36 = vmul.f32 %v4778_v7, %v349_v24  ;;  %v351_v37 = vmax.f32 %v301_v25, 0.0  ;;  %v1151_v40 = vrot.slane %v395_v29, 1  ;;  %v296_v43 = vadd.f32 %v295_v26, %v4768_v1 }
  0xf0   :  { %v376_v42 = vmul.f32 %v4778_v7, %v348_v31  ;;  %v3850_v44 = vpop.f32.mrb[10].mxu1  ;;  %v4856_v46 = vadd.f32 %v4784_v14, %v369_v35  ;;  %v246_v58 = vadd.f32 %v245_v6, %v4768_v1  ;;  %v1149_v4 = vrot.slane %v4848_v33, 1 }
  0xf1   :  { %v4859_v48 = vadd.f32 %v4784_v14, %v377_v36  ;;  %v379_v51 = vmul.f32 %v4778_v7, %v351_v37  ;;  %v311_v52 = vadd.f32 %v3850_v44, %v4768_v1  ;;  %v305_v54 = vpop.f32.mrb[11].mxu1  ;;  %v350_v56 = vmax.f32 %v296_v43, 0.0 }
  0xf2   :  { %v404_v55 = vadd.f32 %v4784_v14, %v376_v42  ;;  %v306_v57 = vadd.f32 %v305_v54, %v4768_v1  ;;  %v1154_v5 = vrot.slane %v4856_v46, 1  ;;  %v340_v16 = vmax.f32 %v246_v58, 0.0 }
  0xf3   :  { %v1168_v8 = vrot.slane %v4859_v48, 1  ;;  %v353_v9 = vmax.f32 %v311_v52, 0.0  ;;  %v407_v10 = vadd.f32 %v4784_v14, %v379_v51  ;;  %v378_v11 = vmul.f32 %v4778_v7, %v350_v56 }
  0xf4   :  { %v352_v13 = vmax.f32 %v306_v57, 0.0  ;;  %v3853_v15 = vpop.f32.mrb[12].mxu1  ;;  %v1166_v18 = vrot.slane %v404_v55, 1  ;;  %v4876_v21 = vsel %vm1142_vm4, %v1143_v61, %v1144_v47  ;;  %v368_v26 = vmul.f32 %v4778_v7, %v340_v16 }
  0xf5   :  { %v381_v19 = vmul.f32 %v4778_v7, %v353_v9  ;;  %v321_v20 = vadd.f32 %v3853_v15, %v4768_v1  ;;  %v315_v6 = vpop.f32.mrb[13].mxu1  ;;  %v4879_v23 = vadd.f32 %v4784_v14, %v378_v11  ;;  %v4890_v35 = vsel %vm1142_vm4, %v1144_v47, %v1146_v28 }
  0xf6   :  { %v380_v24 = vmul.f32 %v4778_v7, %v352_v13  ;;  %v316_v25 = vadd.f32 %v315_v6, %v4768_v1  ;;  %v4895_v61 = vsel %vm1142_vm4, %v1148_v0, %v1149_v4  ;;  %v1171_v36 = vrot.slane %v407_v10, 1  ;;  %v1479_v6 = vld [vmem:[%s5695_s6 + $0x40] sm:$0xff] }
  0xf7   :  { %v4885_v29 = vadd.f32 %v4784_v14, %v381_v19  ;;  %v355_v31 = vmax.f32 %v321_v20, 0.0  ;;  %v4901_v44 = vadd.f32 %v4784_v14, %v368_v26  ;;  %v1169_v51 = vrot.slane %v4879_v23, 1 }
  0xf8   :  { %v4898_v37 = vadd.f32 %v4784_v14, %v380_v24  ;;  %v354_v42 = vmax.f32 %v316_v25, 0.0  ;;  %v3856_v43 = vpop.f32.mrb[14].mxu1  ;;  %v4907_v54 = vsel %vm1142_vm4, %v1149_v4, %v1151_v40  ;;  %v4917_v10 = vsel %vm1142_vm4, %v1154_v5, %v1156_v45  ;;  %v1480_v24 = vld [vmem:[%s5695_s6 + $0x48] sm:$0xff] }
  0xf9   :  { %v383_v52 = vmul.f32 %v4778_v7, %v355_v31  ;;  %v331_v47 = vadd.f32 %v3856_v43, %v4768_v1  ;;  %v325_v28 = vpop.f32.mrb[15].mxu1  ;;  %v1174_v0 = vrot.slane %v4885_v29, 1  ;;  %v1153_v57 = vrot.slane %v4901_v44, 1 }
  0xfa   :  { %v382_v55 = vmul.f32 %v4778_v7, %v354_v42  ;;  %v326_v56 = vadd.f32 %v325_v28, %v4768_v1  ;;  %v1173_v58 = vrot.slane %v4898_v37, 1  ;;  %v4924_v40 = vsel %vm1142_vm4, %v1158_v39, %v1159_v12 }
  0xfb   :  { %v357_v9 = vmax.f32 %v331_v47, 0.0  ;;  %v4928_v15 = vsel %vm1142_vm4, %v1153_v57, %v1154_v5  ;;  %v4935_v34 = vsel %vm1142_vm4, %v1159_v12, %v1161_v59  ;;  %v4938_v45 = vadd.f32 %v4784_v14, %v383_v52 }
  0xfc   :  { %v410_v4 = vadd.f32 %v4784_v14, %v382_v55  ;;  %v356_v11 = vmax.f32 %v326_v56, 0.0  ;;  %v3863_v13 = vpop.f32.mrb[16].mxu1  ;;  %v4947_v5 = vsel %vm1142_vm4, %v1163_v38, %v1164_v27  ;;  %v4954_v12 = vsel %vm1142_vm4, %v1164_v27, %v1166_v18  ;;  %v1481_v27 = vld [vmem:[%s5695_s6 + $0x50] sm:$0xff]  ;;  %v1482_v18 = vld [vmem:[%s5695_s6 + $0x58] sm:$0xff] }
  0xfd   :  { %v385_v39 = vmul.f32 %v4778_v7, %v357_v9  ;;  %v582_v16 = vadd.f32 %v3863_v13, %v4768_v1  ;;  %v576_v19 = vpop.f32.mrb[17].mxu1  ;;  %v4964_v26 = vsel %vm1142_vm4, %v1168_v8, %v1169_v51  ;;  %v4967_v31 = vsel %vm1142_vm4, %v1169_v51, %v1171_v36 }
  0xfe   :  { %v1176_v49 = vrot.slane %v410_v4, 1  ;;  %v384_v20 = vmul.f32 %v4778_v7, %v356_v11  ;;  %v577_v59 = vadd.f32 %v576_v19, %v4768_v1  ;;  %v4979_v47 = vsel %vm1142_vm4, %v1173_v58, %v1174_v0  ;;  %v737_v58 = vld [vmem:[%s5693_s4 + $0x10] sm:$0xff] }
  0xff   :  { %v413_v38 = vadd.f32 %v4784_v14, %v385_v39  ;;  %v688_v25 = vmax.f32 %v582_v16, 0.0  ;;  %v4277_v56 = vpack.c.bf16 %v1480_v24, %v1479_v6  ;;  %v1178_v57 = vrot.slane %v4938_v45, 1  ;;  %v1483_v39 = vld [vmem:[%s5695_s6 + $0x60] sm:$0xff]  ;;  %v1484_v16 = vld [vmem:[%s5695_s6 + $0x68] sm:$0xff] }
 0x100   :  { %v4976_v42 = vadd.f32 %v4784_v14, %v384_v20  ;;  %v687_v43 = vmax.f32 %v577_v59, 0.0  ;;  %v3866_v52 = vpop.f32.mrb[18].mxu1  ;;  %v4982_v8 = vsel %vm1142_vm4, %v1174_v0, %v1176_v49  ;;  %v738_v0 = vld [vmem:[%s5693_s4 + $0x18] sm:$0xff]  ;;  %v4281_v11 = vpack.c.bf16 %v1482_v18, %v1481_v27  ;;  %v743_v18 = vld [vmem:[%s5693_s4 + $0x40] sm:$0xff] }
 0x101   :  { %v1181_v36 = vrot.slane %v413_v38, 1  ;;  %v704_v51 = vmul.f32 %v688_v25, %v4778_v7  ;;  %v591_v28 = vadd.f32 %v3866_v52, %v4768_v1  ;;  %v586_v55 = vpop.f32.mrb[19].mxu1  ;;  %4278 = vmatprep.subr.bf16.mxu1 %v4277_v56  ;;  %v4265_v25 = vpack.c.bf16 %v738_v0, %v737_v58 }
 0x102   :  { %v1179_v9 = vrot.slane %v4976_v42, 1  ;;  %v703_v4 = vmul.f32 %v687_v43, %v4778_v7  ;;  %4280 = vmatpush3.bf16.msra.mxu1 %v4277_v56  ;;  %v744_v43 = vld [vmem:[%s5693_s4 + $0x48] sm:$0xff]  ;;  %v4285_v52 = vpack.c.bf16 %v1484_v16, %v1483_v39 }
 0x103   :  { %v689_v13 = vmax.f32 %v591_v28, 0.0  ;;  %v720_v6 = vadd.f32 %v704_v51, %v4784_v14  ;;  %4282 = vmatprep.subr.bf16.mxu1 %v4281_v11 }
 0x104   :  { %v719_v19 = vadd.f32 %v703_v4, %v4784_v14  ;;  %v3869_v49 = vpop.f32.mrb[20].mxu1  ;;  %v5003_v20 = vsel %vm1142_vm4, %v1178_v57, %v1179_v9  ;;  %v5006_v59 = vsel %vm1142_vm4, %v1179_v9, %v1181_v36  ;;  %v5023_v57 = vpack.c.bf16 %v744_v43, %v743_v18 }
 0x105   :  { %v705_v24 = vmul.f32 %v689_v13, %v4778_v7  ;;  %v595_v38 = vpop.f32.mrb[21].mxu1 }
 0x106   :  { %v596_v27 = vadd.f32 %v595_v38, %v4768_v1  ;;  %3905 = vmatprep.mubr.msk.f32.mxu0 %vm747_vm5, %v719_v19  ;;  %4284 = vmatpush3.bf16.msra.mxu1 %v4281_v11 }
 0x107   :  { %v721_v36 = vadd.f32 %v705_v24, %v4784_v14  ;;  %3906 = vmatmul.mubr.msk.f32.vlgmr.msra.gmra.mrb[8].mxu0 %vm747_vm5, %v720_v6  ;;  %4286 = vmatprep.subr.bf16.mxu1 %v4285_v52 }
 0x108   :  { %v690_v51 = vmax.f32 %v596_v27, 0.0  ;;  %v3872_v28 = vpop.f32.mrb[22].mxu1  ;;  %4264 = vmatpush3.bf16.msra.mxu0 %v4756_v60 }
 0x109   :  { %v610_v55 = vadd.f32 %v3872_v28, %v4768_v1  ;;  %v604_v56 = vpop.f32.mrb[23].mxu1  ;;  %3908 = vmatprep.mubr.msk.f32.mxu0 %vm747_vm5, %v721_v36  ;;  %4266 = vmatprep.subr.bf16.mxu0 %v4265_v25 }
 0x10a   :  { %v706_v9 = vmul.f32 %v690_v51, %v4778_v7  ;;  %v605_v4 = vadd.f32 %v604_v56, %v4768_v1  ;;  %4288 = vmatpush3.bf16.msra.mxu1 %v4285_v52 }
 0x10b   :  { %v692_v58 = vmax.f32 %v610_v55, 0.0 }
 0x10c   :  { %v722_v0 = vadd.f32 %v706_v9, %v4784_v14  ;;  %v691_v13 = vmax.f32 %v605_v4, 0.0  ;;  %v3875_v39 = vpop.f32.mrb[24].mxu1  ;;  %4268 = vmatpush3.bf16.msra.mxu0 %v4265_v25 }
 0x10d   :  { %v708_v60 = vmul.f32 %v692_v58, %v4778_v7  ;;  %v619_v11 = vadd.f32 %v3875_v39, %v4768_v1  ;;  %v614_v16 = vpop.f32.mrb[25].mxu1  ;;  %4270 = vmatprep.subr.bf16.mxu0 %v5023_v57 }
 0x10e   :  { %v707_v19 = vmul.f32 %v691_v13, %v4778_v7  ;;  %3909 = vmatmul.mubr.msk.f32.gmra.mrb[10].mxu0 %vm747_vm5, %v722_v0 }
 0x10f   :  { %v693_v49 = vmax.f32 %v619_v11, 0.0  ;;  %v724_v38 = vadd.f32 %v708_v60, %v4784_v14 }
 0x110   :  { %v723_v6 = vadd.f32 %v707_v19, %v4784_v14  ;;  %v3878_v24 = vpop.f32.mrb[26].mxu1 }
 0x111   :  { %v709_v25 = vmul.f32 %v693_v49, %v4778_v7  ;;  %v623_v27 = vpop.f32.mrb[27].mxu1 }
 0x112   :  { %v624_v18 = vadd.f32 %v623_v27, %v4768_v1  ;;  %3911 = vmatprep.mubr.msk.f32.mxu0 %vm747_vm5, %v723_v6 }
 0x113   :  { %v725_v43 = vadd.f32 %v709_v25, %v4784_v14  ;;  %3912 = vmatmul.mubr.msk.f32.gmra.mrb[12].mxu0 %vm747_vm5, %v724_v38 }
 0x114   :  { %v694_v52 = vmax.f32 %v624_v18, 0.0  ;;  %v3881_v36 = vpop.f32.mrb[28].mxu1 }
 0x115   :  { %v638_v51 = vadd.f32 %v3881_v36, %v4768_v1  ;;  %v632_v28 = vpop.f32.mrb[29].mxu1  ;;  %3914 = vmatprep.mubr.msk.f32.mxu0 %vm747_vm5, %v725_v43 }
 0x116   :  { %v710_v55 = vmul.f32 %v694_v52, %v4778_v7  ;;  %v633_v56 = vadd.f32 %v632_v28, %v4768_v1 }
 0x117   :  { %v696_v9 = vmax.f32 %v638_v51, 0.0 }
 0x118   :  { %v726_v4 = vadd.f32 %v710_v55, %v4784_v14  ;;  %v695_v58 = vmax.f32 %v633_v56, 0.0  ;;  %v3884_v0 = vpop.f32.mrb[30].mxu1 }
 0x119   :  { %v712_v13 = vmul.f32 %v696_v9, %v4778_v7  ;;  %v647_v39 = vadd.f32 %v3884_v0, %v4768_v1  ;;  %v642_v60 = vpop.f32.mrb[31].mxu1 }
 0x11a   :  { %v711_v11 = vmul.f32 %v695_v58, %v4778_v7  ;;  %3915 = vmatmul.mubr.msk.f32.gmra.mrb[14].mxu0 %vm747_vm5, %v726_v4 }
 0x11b   :  { %v697_v16 = vmax.f32 %v647_v39, 0.0  ;;  %v728_v6 = vadd.f32 %v712_v13, %v4784_v14 }
 0x11c   :  { %v727_v19 = vadd.f32 %v711_v11, %v4784_v14  ;;  %v3887_v49 = vpop.f32.mrb[32].mxu1 }
 0x11d   :  { %v713_v24 = vmul.f32 %v697_v16, %v4778_v7  ;;  %v651_v38 = vpop.f32.mrb[33].mxu1 }
 0x11e   :  { %v652_v25 = vadd.f32 %v651_v38, %v4768_v1  ;;  %3917 = vmatprep.mubr.msk.f32.mxu0 %vm747_vm5, %v727_v19 }
 0x11f   :  { %v729_v27 = vadd.f32 %v713_v24, %v4784_v14  ;;  %3918 = vmatmul.mubr.msk.f32.gmra.mrb[16].mxu0 %vm747_vm5, %v728_v6 }
 0x120   :  { %v698_v18 = vmax.f32 %v652_v25, 0.0  ;;  %v3890_v43 = vpop.f32.mrb[34].mxu1 }
 0x121   :  { %v666_v52 = vadd.f32 %v3890_v43, %v4768_v1  ;;  %v660_v36 = vpop.f32.mrb[35].mxu1  ;;  %3920 = vmatprep.mubr.msk.f32.mxu0 %vm747_vm5, %v729_v27  ;;  %v745_v43 = vld [vmem:[%s5693_s4 + $0x50] sm:$0xff] }
 0x122   :  { %v714_v51 = vmul.f32 %v698_v18, %v4778_v7  ;;  %v661_v28 = vadd.f32 %v660_v36, %v4768_v1 }
 0x123   :  { %v700_v55 = vmax.f32 %v666_v52, 0.0 }
 0x124   :  { %v730_v56 = vadd.f32 %v714_v51, %v4784_v14  ;;  %v699_v9 = vmax.f32 %v661_v28, 0.0  ;;  %v3893_v4 = vpop.f32.mrb[36].mxu1 }
 0x125   :  { %v716_v58 = vmul.f32 %v700_v55, %v4778_v7  ;;  %v675_v0 = vadd.f32 %v3893_v4, %v4768_v1  ;;  %v670_v13 = vpop.f32.mrb[37].mxu1 }
 0x126   :  { %v715_v39 = vmul.f32 %v699_v9, %v4778_v7  ;;  %3921 = vmatmul.mubr.msk.f32.gmra.mrb[18].mxu0 %vm747_vm5, %v730_v56 }
 0x127   :  { %v701_v60 = vmax.f32 %v675_v0, 0.0  ;;  %v732_v19 = vadd.f32 %v716_v58, %v4784_v14 }
 0x128   :  { %v731_v11 = vadd.f32 %v715_v39, %v4784_v14  ;;  %v3896_v16 = vpop.f32.mrb[38].mxu1 }
 0x129   :  { %v717_v49 = vmul.f32 %v701_v60, %v4778_v7  ;;  %v679_v6 = vpop.f32.mrb[39].mxu1 }
 0x12a   :  { %v680_v24 = vadd.f32 %v679_v6, %v4768_v1  ;;  %3923 = vmatprep.mubr.msk.f32.mxu0 %vm747_vm5, %v731_v11  ;;  %v746_v1 = vld [vmem:[%s5693_s4 + $0x58] sm:$0xff] }
 0x12b   :  { %v733_v38 = vadd.f32 %v717_v49, %v4784_v14  ;;  %3924 = vmatmul.mubr.msk.f32.gmra.mrb[20].mxu0 %vm747_vm5, %v732_v19  ;;  %v4273_v52 = vpack.c.bf16 %v746_v1, %v745_v43 }
 0x12c   :  { %v702_v25 = vmax.f32 %v680_v24, 0.0 }
 0x12d   :  { %3926 = vmatprep.mubr.msk.f32.mxu0 %vm747_vm5, %v733_v38 }
 0x12e   :  { %v718_v27 = vmul.f32 %v702_v25, %v4778_v7  ;;  %v1485_v7 = vld [vmem:[%s5695_s6 + $0x70] sm:$0xff] }
 0x130   :  { %v734_v18 = vadd.f32 %v718_v27, %v4784_v14  ;;  %v1486_v14 = vld [vmem:[%s5695_s6 + $0x78] sm:$0xff]  ;;  %v1473_v27 = vld [vmem:[%s5695_s6 + $0x10] sm:$0xff] }
 0x132   :  { %3927 = vmatmul.mubr.msk.f32.gmra.mrb[22].mxu0 %vm747_vm5, %v734_v18  ;;  %v1474_v18 = vld [vmem:[%s5695_s6 + $0x18] sm:$0xff] }
 0x133   :  { %3937 = vmatprep.mubr.msk.f32.mxu0 %vm747_vm5, %v4806_v41  ;;  %v1472_v41 = vld [vmem:[%s5695_s6 + $0x8] sm:$0xff] }
 0x136   :  { %3938 = vmatmul.mubr.msk.f32.vlgmr.msra.gmra.mrb[8].mxu0 %vm747_vm5, %v4798_v32  ;;  %v1471_v32 = vld [vmem:[%s5695_s6] sm:$0xff] }
 0x137   :  { %3940 = vmatprep.mubr.msk.f32.mxu0 %vm747_vm5, %v4817_v50  ;;  %4272 = vmatpush3.bf16.msra.mxu0 %v5023_v57  ;;  %v5159_v50 = vpack.c.bf16 %v1472_v41, %v1471_v32  ;;  %v4297_v41 = vpack.c.bf16 %v1474_v18, %v1473_v27 }
 0x138   :  { %4274 = vmatprep.subr.bf16.mxu0 %v4273_v52 }
 0x13a   :  { %3941 = vmatmul.mubr.msk.f32.gmra.mrb[10].mxu0 %vm747_vm5, %v4848_v33 }
 0x13b   :  { %3943 = vmatprep.mubr.msk.f32.mxu0 %vm747_vm5, %v4901_v44  ;;  %4276 = vmatpush3.bf16.msra.mxu0 %v4273_v52 }
 0x13e   :  { %3944 = vmatmul.mubr.msk.f32.gmra.mrb[12].mxu0 %vm747_vm5, %v4856_v46  ;;  %v1376_v46 = vld [vmem:[%s5697_s5] sm:$0x7] }
 0x13f   :  { %3946 = vmatprep.mubr.msk.f32.mxu0 %vm747_vm5, %v4795_v30  ;;  %v4289_v30 = vpack.c.bf16 %v1486_v14, %v1485_v7  ;;  %v5182_v44 = vrot.slane %v1376_v46, %v4774_v3 }
 0x141   :  { %4290 = vmatprep.subr.bf16.mxu1 %v4289_v30 }
 0x142   :  { %3947 = vmatmul.mubr.msk.f32.gmra.mrb[14].mxu0 %vm747_vm5, %v4822_v53  ;;  %4292 = vmatpush3.bf16.msra.mxu1 %v4289_v30  ;;  %v4458_v53 = vmov 0.0  }
 0x143   :  { %3949 = vmatprep.mubr.msk.f32.mxu0 %vm747_vm5, %v4842_v22  ;;  %4294 = vmatprep.subr.bf16.mxu1 %v5159_v50  ;;  %1470 = vst.msk [vmem:[#allocation2 + $0x80] sm:$0xff] %vm1453_vm6, %v4458_v53  ;;  %v2237_v22 = vld [vmem:[%s5696_s8 + $0x28] sm:$0xff] }
 0x144   :  { %2231 = vst.msk [vmem:[#allocation3 + $0x80] sm:$0xff] %vm747_vm5, %v4458_v53  ;;  %v1475_v53 = vld [vmem:[%s5695_s6 + $0x20] sm:$0xff] }
 0x146   :  { %3950 = vmatmul.mubr.msk.f32.gmra.mrb[16].mxu0 %vm747_vm5, %v4836_v17  ;;  %v2236_v17 = vld [vmem:[%s5696_s8 + $0x20] sm:$0xff] }
 0x147   :  { %3952 = vmatprep.mubr.msk.f32.mxu0 %vm747_vm5, %v4859_v48  ;;  %v4325_v33 = vpack.c.bf16 %v2237_v22, %v2236_v17  ;;  %v5174_v48 = vrot.slane %v1376_v46, %v4762_v63 }
 0x149   :  { %4326 = vmatprep.subr.bf16.mxu0 %v4325_v33 }
 0x14a   :  { %3953 = vmatmul.mubr.msk.f32.gmra.mrb[18].mxu0 %vm747_vm5, %v4879_v23 }
 0x14b   :  { %3955 = vmatprep.mubr.msk.f32.mxu0 %vm747_vm5, %v4898_v37 }
 0x14e   :  { %3956 = vmatmul.mubr.msk.f32.gmra.mrb[20].mxu0 %vm747_vm5, %v4885_v29  ;;  %v5178_v29 = vrot.slane %v1376_v46, %v4771_v2 }
 0x14f   :  { %3958 = vmatprep.mubr.msk.f32.mxu0 %vm747_vm5, %v4938_v45 }
 0x152   :  { %3959 = vmatmul.mubr.msk.f32.gmra.mrb[22].mxu0 %vm747_vm5, %v4976_v42 }
 0x153   :  { %3969 = vmatprep.mubr.msk.f32.mxu0 %vm747_vm5, %v4876_v21 }
 0x156   :  { %3970 = vmatmul.mubr.msk.f32.vlgmr.msra.gmra.mrb[8].mxu0 %vm747_vm5, %v4890_v35 }
 0x157   :  { %3972 = vmatprep.mubr.msk.f32.mxu0 %vm747_vm5, %v4895_v61  ;;  %4328 = vmatpush3.bf16.msra.mxu0 %v4325_v33 }
 0x15a   :  { %3973 = vmatmul.mubr.msk.f32.gmra.mrb[10].mxu0 %vm747_vm5, %v4907_v54 }
 0x15b   :  { %3975 = vmatprep.mubr.msk.f32.mxu0 %vm747_vm5, %v4928_v15 }
 0x15e   :  { %3976 = vmatmul.mubr.msk.f32.gmra.mrb[12].mxu0 %vm747_vm5, %v4917_v10 }
 0x15f   :  { %3978 = vmatprep.mubr.msk.f32.mxu0 %vm747_vm5, %v4924_v40 }
 0x162   :  { %3979 = vmatmul.mubr.msk.f32.gmra.mrb[14].mxu0 %vm747_vm5, %v4935_v34 }
 0x163   :  { %3981 = vmatprep.mubr.msk.f32.mxu0 %vm747_vm5, %v4947_v5 }
 0x166   :  { %3982 = vmatmul.mubr.msk.f32.gmra.mrb[16].mxu0 %vm747_vm5, %v4954_v12 }
 0x167   :  { %3984 = vmatprep.mubr.msk.f32.mxu0 %vm747_vm5, %v4964_v26 }
 0x16a   :  { %3985 = vmatmul.mubr.msk.f32.gmra.mrb[18].mxu0 %vm747_vm5, %v4967_v31 }
 0x16b   :  { %3987 = vmatprep.mubr.msk.f32.mxu0 %vm747_vm5, %v4979_v47 }
 0x16e   :  { %3988 = vmatmul.mubr.msk.f32.gmra.mrb[20].mxu0 %vm747_vm5, %v4982_v8 }
 0x16f   :  { %3990 = vmatprep.mubr.msk.f32.mxu0 %vm747_vm5, %v5003_v20 }
 0x172   :  { %3991 = vmatmul.mubr.msk.f32.gmra.mrb[22].mxu0 %vm747_vm5, %v5006_v59 }
 0x229   :  { %v3971_v21 = vpop.f32.mrb[8].mxu0 }
 0x22a   :  { %v1382_v23 = vadd.f32 %v3971_v21, %v5174_v48  ;;  %v1281_v35 = vpop.f32.mrb[9].mxu0 }
 0x22b   :  { %v1381_v61 = vadd.f32 %v5174_v48, %v1281_v35 }
 0x22c   :  { %v1398_v37 = vmax.f32 %v1382_v23, 0.0  ;;  %v1476_v23 = vld [vmem:[%s5695_s6 + $0x28] sm:$0xff] }
 0x22d   :  { %v1397_v54 = vmax.f32 %v1381_v61, 0.0  ;;  %v3974_v10 = vpop.f32.mrb[10].mxu0 }
 0x22e   :  { %v1418_v40 = vmul.f32 %v5178_v29, %v1398_v37  ;;  %v1384_v15 = vadd.f32 %v3974_v10, %v5174_v48  ;;  %v1291_v34 = vpop.f32.mrb[11].mxu0 }
 0x22f   :  { %v1417_v45 = vmul.f32 %v5178_v29, %v1397_v54  ;;  %v1383_v5 = vadd.f32 %v5174_v48, %v1291_v34  ;;  %v4301_v34 = vpack.c.bf16 %v1476_v23, %v1475_v53 }
 0x230   :  { %v1438_v12 = vadd.f32 %v5182_v44, %v1418_v40  ;;  %v1400_v26 = vmax.f32 %v1384_v15, 0.0 }
 0x231   :  { %v1437_v31 = vadd.f32 %v5182_v44, %v1417_v45  ;;  %v1399_v42 = vmax.f32 %v1383_v5, 0.0  ;;  %v3977_v47 = vpop.f32.mrb[12].mxu0  ;;  %v1477_v45 = vld [vmem:[%s5695_s6 + $0x30] sm:$0xff] }
 0x232   :  { %1455 = vst.msk [vmem:[#allocation2 + $0x8] sm:$0xff] %vm1453_vm6, %v1438_v12  ;;  %v1420_v8 = vmul.f32 %v5178_v29, %v1400_v26  ;;  %v1386_v20 = vadd.f32 %v3977_v47, %v5174_v48  ;;  %v1301_v59 = vpop.f32.mrb[13].mxu0 }
 0x233   :  { %1454 = vst.msk [vmem:[#allocation2] sm:$0xff] %vm1453_vm6, %v1437_v31  ;;  %v1419_v57 = vmul.f32 %v5178_v29, %v1399_v42  ;;  %v1385_v36 = vadd.f32 %v5174_v48, %v1301_v59 }
 0x234   :  { %v1440_v51 = vadd.f32 %v5182_v44, %v1420_v8  ;;  %v1402_v28 = vmax.f32 %v1386_v20, 0.0 }
 0x235   :  { %v1439_v55 = vadd.f32 %v5182_v44, %v1419_v57  ;;  %v1401_v56 = vmax.f32 %v1385_v36, 0.0  ;;  %v3980_v9 = vpop.f32.mrb[14].mxu0 }
 0x236   :  { %1457 = vst.msk [vmem:[#allocation2 + $0x18] sm:$0xff] %vm1453_vm6, %v1440_v51  ;;  %v1422_v4 = vmul.f32 %v5178_v29, %v1402_v28  ;;  %v1388_v58 = vadd.f32 %v3980_v9, %v5174_v48  ;;  %v1311_v0 = vpop.f32.mrb[15].mxu0 }
 0x237   :  { %1456 = vst.msk [vmem:[#allocation2 + $0x10] sm:$0xff] %vm1453_vm6, %v1439_v55  ;;  %v1421_v13 = vmul.f32 %v5178_v29, %v1401_v56  ;;  %v1387_v39 = vadd.f32 %v5174_v48, %v1311_v0  ;;  %v1487_v55 = vld [vmem:[%s5695_s6 + $0x80] sm:$0xff] }
 0x238   :  { %v1442_v60 = vadd.f32 %v5182_v44, %v1422_v4  ;;  %v1404_v11 = vmax.f32 %v1388_v58, 0.0 }
 0x239   :  { %v1441_v16 = vadd.f32 %v5182_v44, %v1421_v13  ;;  %v1403_v19 = vmax.f32 %v1387_v39, 0.0  ;;  %v3983_v49 = vpop.f32.mrb[16].mxu0  ;;  %v1488_v13 = vld [vmem:[%s5695_s6 + $0x88] sm:$0xff] }
 0x23a   :  { %1459 = vst.msk [vmem:[#allocation2 + $0x28] sm:$0xff] %vm1453_vm6, %v1442_v60  ;;  %v1424_v6 = vmul.f32 %v5178_v29, %v1404_v11  ;;  %v1390_v24 = vadd.f32 %v3983_v49, %v5174_v48  ;;  %v1321_v38 = vpop.f32.mrb[17].mxu0  ;;  %v1511_v25 = vld [vmem:[#allocation2 + $0x1] sm:$0xff] }
 0x23b   :  { %1458 = vst.msk [vmem:[#allocation2 + $0x20] sm:$0xff] %vm1453_vm6, %v1441_v16  ;;  %v1423_v43 = vmul.f32 %v5178_v29, %v1403_v19  ;;  %v1389_v1 = vadd.f32 %v5174_v48, %v1321_v38  ;;  %4009 = vmatprep.mubr.msk.f32.mxu1 %vm1453_vm6, %v1511_v25 }
 0x23c   :  { %v1444_v52 = vadd.f32 %v5182_v44, %v1424_v6  ;;  %v1406_v7 = vmax.f32 %v1390_v24, 0.0  ;;  %v4309_v6 = vpack.c.bf16 %v1488_v13, %v1487_v55 }
 0x23d   :  { %v1443_v14 = vadd.f32 %v5182_v44, %v1423_v43  ;;  %v1405_v30 = vmax.f32 %v1389_v1, 0.0  ;;  %v3986_v32 = vpop.f32.mrb[18].mxu0  ;;  %v1498_v23 = vld [vmem:[#allocation2 + $0x18] sm:$0xff] }
 0x23e   :  { %1461 = vst.msk [vmem:[#allocation2 + $0x38] sm:$0xff] %vm1453_vm6, %v1444_v52  ;;  %v1426_v17 = vmul.f32 %v5178_v29, %v1406_v7  ;;  %v1392_v22 = vadd.f32 %v3986_v32, %v5174_v48  ;;  %v1331_v33 = vpop.f32.mrb[19].mxu0  ;;  %v1512_v46 = vld [vmem:[#allocation2 + $0x9] sm:$0xff]  ;;  %v1513_v21 = vld [vmem:[#allocation2 + $0x11] sm:$0xff] }
 0x23f   :  { %1460 = vst.msk [vmem:[#allocation2 + $0x30] sm:$0xff] %vm1453_vm6, %v1443_v14  ;;  %v1425_v35 = vmul.f32 %v5178_v29, %v1405_v30  ;;  %v1391_v61 = vadd.f32 %v5174_v48, %v1331_v33  ;;  %4010 = vmatmul.mubr.msk.f32.vlgmr.msra.gmra.mrb[40].mxu1 %vm1453_vm6, %v1512_v46  ;;  %v1489_v30 = vld [vmem:[%s5695_s6 + $0x90] sm:$0xff]  ;;  %v1490_v32 = vld [vmem:[%s5695_s6 + $0x98] sm:$0xff]  ;;  %v1492_v33 = vld [vmem:[%s5695_s6 + $0xa8] sm:$0xff] }
 0x240   :  { %v1446_v37 = vadd.f32 %v5182_v44, %v1426_v17  ;;  %v1408_v54 = vmax.f32 %v1392_v22, 0.0  ;;  %4012 = vmatprep.mubr.msk.f32.mxu1 %vm1453_vm6, %v1513_v21  ;;  %4296 = vmatpush3.bf16.msra.mxu1 %v5159_v50  ;;  %v1478_v50 = vld [vmem:[%s5695_s6 + $0x38] sm:$0xff]  ;;  %v4313_v53 = vpack.c.bf16 %v1490_v32, %v1489_v30  ;;  %v1496_v17 = vld [vmem:[#allocation2 + $0x8] sm:$0xff]  ;;  %v1491_v22 = vld [vmem:[%s5695_s6 + $0xa0] sm:$0xff] }
 0x241   :  { %v1445_v10 = vadd.f32 %v5182_v44, %v1425_v35  ;;  %v1407_v40 = vmax.f32 %v1391_v61, 0.0  ;;  %v3989_v15 = vpop.f32.mrb[20].mxu0  ;;  %4298 = vmatprep.subr.bf16.mxu1 %v4297_v41  ;;  %v4305_v28 = vpack.c.bf16 %v1478_v50, %v1477_v45  ;;  %v1497_v46 = vld [vmem:[#allocation2 + $0x10] sm:$0xff]  ;;  %v4317_v21 = vpack.c.bf16 %v1492_v33, %v1491_v22  ;;  %v1494_v61 = vld [vmem:[%s5695_s6 + $0xb8] sm:$0xff] }
 0x242   :  { %1463 = vst.msk [vmem:[#allocation2 + $0x48] sm:$0xff] %vm1453_vm6, %v1446_v37  ;;  %v1428_v5 = vmul.f32 %v5178_v29, %v1408_v54  ;;  %v1394_v12 = vadd.f32 %v3989_v15, %v5174_v48  ;;  %v1341_v26 = vpop.f32.mrb[21].mxu0  ;;  %v1514_v31 = vld [vmem:[#allocation2 + $0x19] sm:$0xff]  ;;  %v1515_v42 = vld [vmem:[#allocation2 + $0x21] sm:$0xff]  ;;  %v1493_v35 = vld [vmem:[%s5695_s6 + $0xb0] sm:$0xff] }
 0x243   :  { %1462 = vst.msk [vmem:[#allocation2 + $0x40] sm:$0xff] %vm1453_vm6, %v1445_v10  ;;  %v1427_v47 = vmul.f32 %v5178_v29, %v1407_v40  ;;  %v1393_v8 = vadd.f32 %v5174_v48, %v1341_v26  ;;  %4013 = vmatmul.mubr.msk.f32.gmra.mrb[42].mxu1 %vm1453_vm6, %v1514_v31  ;;  %v1499_v37 = vld [vmem:[#allocation2 + $0x20] sm:$0xff]  ;;  %v4321_v54 = vpack.c.bf16 %v1494_v61, %v1493_v35  ;;  %v1500_v10 = vld [vmem:[#allocation2 + $0x28] sm:$0xff] }
 0x244   :  { %v1448_v20 = vadd.f32 %v5182_v44, %v1428_v5  ;;  %v1410_v59 = vmax.f32 %v1394_v12, 0.0  ;;  %4015 = vmatprep.mubr.msk.f32.mxu1 %vm1453_vm6, %v1515_v42  ;;  %4300 = vmatpush3.bf16.msra.mxu1 %v4297_v41  ;;  %v1495_v41 = vld [vmem:[#allocation2] sm:$0xff] }
 0x245   :  { %v1447_v57 = vadd.f32 %v5182_v44, %v1427_v47  ;;  %v1409_v36 = vmax.f32 %v1393_v8, 0.0  ;;  %v3992_v51 = vpop.f32.mrb[22].mxu0  ;;  %4302 = vmatprep.subr.bf16.mxu1 %v4301_v34  ;;  %v1502_v15 = vld [vmem:[#allocation2 + $0x38] sm:$0xff]  ;;  %v1913_v47 = vld [vmem:[#allocation2 + $0x2] sm:$0xff]  ;;  %v1914_v8 = vld [vmem:[#allocation2 + $0xa] sm:$0xff] }
 0x246   :  { %1465 = vst.msk [vmem:[#allocation2 + $0x58] sm:$0xff] %vm1453_vm6, %v1448_v20  ;;  %v1430_v56 = vmul.f32 %v5178_v29, %v1410_v59  ;;  %v1396_v9 = vadd.f32 %v3992_v51, %v5174_v48  ;;  %v1351_v4 = vpop.f32.mrb[23].mxu0  ;;  %v1516_v58 = vld [vmem:[#allocation2 + $0x29] sm:$0xff]  ;;  %v1517_v0 = vld [vmem:[#allocation2 + $0x31] sm:$0xff]  ;;  %v1916_v59 = vld [vmem:[#allocation2 + $0x1a] sm:$0xff] }
 0x247   :  { %1464 = vst.msk [vmem:[#allocation2 + $0x50] sm:$0xff] %vm1453_vm6, %v1447_v57  ;;  %v1429_v39 = vmul.f32 %v5178_v29, %v1409_v36  ;;  %v1395_v60 = vadd.f32 %v5174_v48, %v1351_v4  ;;  %4016 = vmatmul.mubr.msk.f32.gmra.mrb[44].mxu1 %vm1453_vm6, %v1516_v58  ;;  %v1501_v40 = vld [vmem:[#allocation2 + $0x30] sm:$0xff]  ;;  %v1917_v57 = vld [vmem:[#allocation2 + $0x22] sm:$0xff] }
 0x248   :  { %v1450_v11 = vadd.f32 %v5182_v44, %v1430_v56  ;;  %v1412_v16 = vmax.f32 %v1396_v9, 0.0  ;;  %4018 = vmatprep.mubr.msk.f32.mxu1 %vm1453_vm6, %v1517_v0  ;;  %4304 = vmatpush3.bf16.msra.mxu1 %v4301_v34  ;;  %v1915_v20 = vld [vmem:[#allocation2 + $0x12] sm:$0xff]  ;;  %v1918_v36 = vld [vmem:[#allocation2 + $0x2a] sm:$0xff] }
 0x249   :  { %v1449_v19 = vadd.f32 %v5182_v44, %v1429_v39  ;;  %v1411_v49 = vmax.f32 %v1395_v60, 0.0  ;;  %4306 = vmatprep.subr.bf16.mxu1 %v4305_v28  ;;  %v1504_v45 = vld [vmem:[#allocation2 + $0x48] sm:$0xff]  ;;  %v1919_v51 = vld [vmem:[#allocation2 + $0x32] sm:$0xff] }
 0x24a   :  { %1467 = vst.msk [vmem:[#allocation2 + $0x68] sm:$0xff] %vm1453_vm6, %v1450_v11  ;;  %v1432_v24 = vmul.f32 %v5178_v29, %v1412_v16  ;;  %v1518_v38 = vld [vmem:[#allocation2 + $0x39] sm:$0xff]  ;;  %v1519_v25 = vld [vmem:[#allocation2 + $0x41] sm:$0xff]  ;;  %v2238_v60 = vld [vmem:[%s5696_s8 + $0x30] sm:$0xff] }
 0x24b   :  { %1466 = vst.msk [vmem:[#allocation2 + $0x60] sm:$0xff] %vm1453_vm6, %v1449_v19  ;;  %v1431_v48 = vmul.f32 %v5178_v29, %v1411_v49  ;;  %4019 = vmatmul.mubr.msk.f32.gmra.mrb[46].mxu1 %vm1453_vm6, %v1518_v38  ;;  %v1503_v34 = vld [vmem:[#allocation2 + $0x40] sm:$0xff]  ;;  %v2239_v11 = vld [vmem:[%s5696_s8 + $0x38] sm:$0xff]  ;;  %v2233_v49 = vld [vmem:[%s5696_s8 + $0x8] sm:$0xff] }
 0x24c   :  { %v1452_v27 = vadd.f32 %v5182_v44, %v1432_v24  ;;  %4021 = vmatprep.mubr.msk.f32.mxu1 %vm1453_vm6, %v1519_v25  ;;  %4308 = vmatpush3.bf16.msra.mxu1 %v4305_v28  ;;  %v1920_v28 = vld [vmem:[#allocation2 + $0x3a] sm:$0xff]  ;;  %v1921_v55 = vld [vmem:[#allocation2 + $0x42] sm:$0xff]  ;;  %v4329_v16 = vpack.c.bf16 %v2239_v11, %v2238_v60  ;;  %v2966_v25 = vld [vmem:[%s5698_s10 + $0x10] sm:$0xff] }
 0x24d   :  { %v1451_v18 = vadd.f32 %v5182_v44, %v1431_v48  ;;  %4310 = vmatprep.subr.bf16.mxu1 %v4309_v6  ;;  %v1506_v12 = vld [vmem:[#allocation2 + $0x58] sm:$0xff]  ;;  %v2232_v19 = vld [vmem:[%s5696_s8] sm:$0xff]  ;;  %v2965_v38 = vld [vmem:[%s5698_s10 + $0x8] sm:$0xff] }
 0x24e   :  { %1469 = vst.msk [vmem:[#allocation2 + $0x78] sm:$0xff] %vm1453_vm6, %v1452_v27  ;;  %v1520_v43 = vld [vmem:[#allocation2 + $0x49] sm:$0xff]  ;;  %v1521_v1 = vld [vmem:[#allocation2 + $0x51] sm:$0xff]  ;;  %4330 = vmatprep.subr.bf16.mxu0 %v4329_v16  ;;  %v2964_v24 = vld [vmem:[%s5698_s10] sm:$0xff] }
 0x24f   :  { %1468 = vst.msk [vmem:[#allocation2 + $0x70] sm:$0xff] %vm1453_vm6, %v1451_v18  ;;  %4022 = vmatmul.mubr.msk.f32.gmra.mrb[48].mxu1 %vm1453_vm6, %v1520_v43  ;;  %v1505_v5 = vld [vmem:[#allocation2 + $0x50] sm:$0xff]  ;;  %4332 = vmatpush3.bf16.msra.mxu0 %v4329_v16  ;;  %v4349_v48 = vpack.c.bf16 %v2965_v38, %v2964_v24  ;;  %v2967_v27 = vld [vmem:[%s5698_s10 + $0x18] sm:$0xff]  ;;  %v2138_v43 = vld [vmem:[%s5699_s7] sm:$0x7] }
 0x250   :  { %4024 = vmatprep.mubr.msk.f32.mxu1 %vm1453_vm6, %v1521_v1  ;;  %v1922_v56 = vld [vmem:[#allocation2 + $0x4a] sm:$0xff]  ;;  %v1923_v9 = vld [vmem:[#allocation2 + $0x52] sm:$0xff]  ;;  %v4353_v18 = vpack.c.bf16 %v2967_v27, %v2966_v25  ;;  %v5368_v1 = vrot.slane %v2138_v43, %v4762_v63  ;;  %v5376_v32 = vrot.slane %v2138_v43, %v4774_v3  ;;  %v2240_v25 = vld [vmem:[%s5696_s8 + $0x40] sm:$0xff] }
 0x251   :  { %v1508_v31 = vld [vmem:[#allocation2 + $0x68] sm:$0xff] }
 0x252   :  { %v1522_v29 = vld [vmem:[#allocation2 + $0x59] sm:$0xff]  ;;  %v1523_v52 = vld [vmem:[#allocation2 + $0x61] sm:$0xff] }
 0x253   :  { %4025 = vmatmul.mubr.msk.f32.gmra.mrb[50].mxu1 %vm1453_vm6, %v1522_v29  ;;  %v1507_v26 = vld [vmem:[#allocation2 + $0x60] sm:$0xff] }
 0x254   :  { %4027 = vmatprep.mubr.msk.f32.mxu1 %vm1453_vm6, %v1523_v52  ;;  %v1924_v4 = vld [vmem:[#allocation2 + $0x5a] sm:$0xff]  ;;  %v1925_v58 = vld [vmem:[#allocation2 + $0x62] sm:$0xff] }
 0x255   :  { %v1526_v44 = vld [vmem:[#allocation2 + $0x79] sm:$0xff] }
 0x256   :  { %v1524_v7 = vld [vmem:[#allocation2 + $0x69] sm:$0xff]  ;;  %v1525_v14 = vld [vmem:[#allocation2 + $0x71] sm:$0xff]  ;;  %v1928_v39 = vld [vmem:[#allocation2 + $0x7a] sm:$0xff] }
 0x257   :  { %4028 = vmatmul.mubr.msk.f32.gmra.mrb[52].mxu1 %vm1453_vm6, %v1524_v7  ;;  %v1509_v42 = vld [vmem:[#allocation2 + $0x70] sm:$0xff]  ;;  %v1510_v50 = vld [vmem:[#allocation2 + $0x78] sm:$0xff]  ;;  %v5372_v7 = vrot.slane %v2138_v43, %v4771_v2 }
 0x258   :  { %4030 = vmatprep.mubr.msk.f32.mxu1 %vm1453_vm6, %v1525_v14  ;;  %v1926_v0 = vld [vmem:[#allocation2 + $0x6a] sm:$0xff]  ;;  %v1927_v13 = vld [vmem:[#allocation2 + $0x72] sm:$0xff] }
 0x25b   :  { %4031 = vmatmul.mubr.msk.f32.gmra.mrb[54].mxu1 %vm1453_vm6, %v1526_v44 }
 0x25c   :  { %4049 = vmatprep.mubr.msk.f32.mxu1 %vm1453_vm6, %v1495_v41 }
 0x25f   :  { %4050 = vmatmul.mubr.msk.f32.vlgmr.msra.gmra.mrb[40].mxu1 %vm1453_vm6, %v1496_v17 }
 0x260   :  { %4052 = vmatprep.mubr.msk.f32.mxu1 %vm1453_vm6, %v1497_v46  ;;  %4312 = vmatpush3.bf16.msra.mxu1 %v4309_v6  ;;  %v5349_v6 = vpack.c.bf16 %v2233_v49, %v2232_v19 }
 0x261   :  { %4314 = vmatprep.subr.bf16.mxu1 %v4313_v53 }
 0x262   :  { %4334 = vmatprep.subr.bf16.mxu0 %v5349_v6 }
 0x263   :  { %4053 = vmatmul.mubr.msk.f32.gmra.mrb[42].mxu1 %vm1453_vm6, %v1498_v23 }
 0x264   :  { %4055 = vmatprep.mubr.msk.f32.mxu1 %vm1453_vm6, %v1499_v37  ;;  %4316 = vmatpush3.bf16.msra.mxu1 %v4313_v53 }
 0x265   :  { %4318 = vmatprep.subr.bf16.mxu1 %v4317_v21 }
 0x267   :  { %4056 = vmatmul.mubr.msk.f32.gmra.mrb[44].mxu1 %vm1453_vm6, %v1500_v10 }
 0x268   :  { %4058 = vmatprep.mubr.msk.f32.mxu1 %vm1453_vm6, %v1501_v40  ;;  %4320 = vmatpush3.bf16.msra.mxu1 %v4317_v21 }
 0x269   :  { %4322 = vmatprep.subr.bf16.mxu1 %v4321_v54 }
 0x26b   :  { %4059 = vmatmul.mubr.msk.f32.gmra.mrb[46].mxu1 %vm1453_vm6, %v1502_v15 }
 0x26c   :  { %4061 = vmatprep.mubr.msk.f32.mxu1 %vm1453_vm6, %v1503_v34  ;;  %4324 = vmatpush3.bf16.msra.mxu1 %v4321_v54 }
 0x26d   :  { %4350 = vmatprep.subr.bf16.mxu1 %v4349_v48 }
 0x26f   :  { %4062 = vmatmul.mubr.msk.f32.gmra.mrb[48].mxu1 %vm1453_vm6, %v1504_v45 }
 0x270   :  { %4064 = vmatprep.mubr.msk.f32.mxu1 %vm1453_vm6, %v1505_v5 }
 0x273   :  { %4065 = vmatmul.mubr.msk.f32.gmra.mrb[50].mxu1 %vm1453_vm6, %v1506_v12 }
 0x274   :  { %4067 = vmatprep.mubr.msk.f32.mxu1 %vm1453_vm6, %v1507_v26 }
 0x277   :  { %4068 = vmatmul.mubr.msk.f32.gmra.mrb[52].mxu1 %vm1453_vm6, %v1508_v31 }
 0x278   :  { %4070 = vmatprep.mubr.msk.f32.mxu1 %vm1453_vm6, %v1509_v42 }
 0x27b   :  { %4071 = vmatmul.mubr.msk.f32.gmra.mrb[54].mxu1 %vm1453_vm6, %v1510_v50 }
 0x27c   :  { %4089 = vmatprep.mubr.msk.f32.mxu1 %vm1453_vm6, %v1913_v47 }
 0x27f   :  { %4090 = vmatmul.mubr.msk.f32.vlgmr.msra.gmra.mrb[40].mxu1 %vm1453_vm6, %v1914_v8 }
 0x280   :  { %4092 = vmatprep.mubr.msk.f32.mxu1 %vm1453_vm6, %v1915_v20  ;;  %4352 = vmatpush3.bf16.msra.mxu1 %v4349_v48 }
 0x281   :  { %4354 = vmatprep.subr.bf16.mxu1 %v4353_v18 }
 0x283   :  { %4093 = vmatmul.mubr.msk.f32.gmra.mrb[42].mxu1 %vm1453_vm6, %v1916_v59 }
 0x284   :  { %4095 = vmatprep.mubr.msk.f32.mxu1 %vm1453_vm6, %v1917_v57  ;;  %4356 = vmatpush3.bf16.msra.mxu1 %v4353_v18 }
 0x287   :  { %4096 = vmatmul.mubr.msk.f32.gmra.mrb[44].mxu1 %vm1453_vm6, %v1918_v36 }
 0x288   :  { %4098 = vmatprep.mubr.msk.f32.mxu1 %vm1453_vm6, %v1919_v51 }
 0x28b   :  { %4099 = vmatmul.mubr.msk.f32.gmra.mrb[46].mxu1 %vm1453_vm6, %v1920_v28 }
 0x28c   :  { %4101 = vmatprep.mubr.msk.f32.mxu1 %vm1453_vm6, %v1921_v55 }
 0x28f   :  { %4102 = vmatmul.mubr.msk.f32.gmra.mrb[48].mxu1 %vm1453_vm6, %v1922_v56 }
 0x290   :  { %4104 = vmatprep.mubr.msk.f32.mxu1 %vm1453_vm6, %v1923_v9 }
 0x293   :  { %4105 = vmatmul.mubr.msk.f32.gmra.mrb[50].mxu1 %vm1453_vm6, %v1924_v4 }
 0x294   :  { %4107 = vmatprep.mubr.msk.f32.mxu1 %vm1453_vm6, %v1925_v58 }
 0x297   :  { %4108 = vmatmul.mubr.msk.f32.gmra.mrb[52].mxu1 %vm1453_vm6, %v1926_v0  ;;  %v2234_v0 = vld [vmem:[%s5696_s8 + $0x10] sm:$0xff] }
 0x298   :  { %4110 = vmatprep.mubr.msk.f32.mxu1 %vm1453_vm6, %v1927_v13  ;;  %v2235_v13 = vld [vmem:[%s5696_s8 + $0x18] sm:$0xff] }
 0x299   :  { %v4337_v38 = vpack.c.bf16 %v2235_v13, %v2234_v0  ;;  %v2242_v13 = vld [vmem:[%s5696_s8 + $0x50] sm:$0xff] }
 0x29b   :  { %4111 = vmatmul.mubr.msk.f32.gmra.mrb[54].mxu1 %vm1453_vm6, %v1928_v39 }
 0x352   :  { %v4091_v29 = vpop.f32.mrb[40].mxu1 }
 0x353   :  { %v2144_v52 = vadd.f32 %v4091_v29, %v5368_v1  ;;  %v2043_v14 = vpop.f32.mrb[41].mxu1 }
 0x354   :  { %v2143_v44 = vadd.f32 %v5368_v1, %v2043_v14 }
 0x355   :  { %v2160_v30 = vmax.f32 %v2144_v52, 0.0  ;;  %v2241_v52 = vld [vmem:[%s5696_s8 + $0x48] sm:$0xff] }
 0x356   :  { %v2159_v41 = vmax.f32 %v2143_v44, 0.0  ;;  %v4094_v53 = vpop.f32.mrb[42].mxu1 }
 0x357   :  { %v2180_v17 = vmul.f32 %v5372_v7, %v2160_v30  ;;  %v2146_v22 = vadd.f32 %v4094_v53, %v5368_v1  ;;  %v2053_v33 = vpop.f32.mrb[43].mxu1 }
 0x358   :  { %v2179_v46 = vmul.f32 %v5372_v7, %v2159_v41  ;;  %v2145_v21 = vadd.f32 %v5368_v1, %v2053_v33  ;;  %v5432_v33 = vpack.c.bf16 %v2241_v52, %v2240_v25 }
 0x359   :  { %v2200_v23 = vadd.f32 %v5376_v32, %v2180_v17  ;;  %v2162_v35 = vmax.f32 %v2146_v22, 0.0 }
 0x35a   :  { %v2199_v61 = vadd.f32 %v5376_v32, %v2179_v46  ;;  %v2161_v37 = vmax.f32 %v2145_v21, 0.0  ;;  %v4097_v54 = vpop.f32.mrb[44].mxu1 }
 0x35b   :  { %2216 = vst.msk [vmem:[#allocation3 + $0x8] sm:$0xff] %vm747_vm5, %v2200_v23  ;;  %v2182_v10 = vmul.f32 %v5372_v7, %v2162_v35  ;;  %v2148_v40 = vadd.f32 %v4097_v54, %v5368_v1  ;;  %v2063_v15 = vpop.f32.mrb[45].mxu1 }
 0x35c   :  { %2215 = vst.msk [vmem:[#allocation3] sm:$0xff] %vm747_vm5, %v2199_v61  ;;  %v2181_v34 = vmul.f32 %v5372_v7, %v2161_v37  ;;  %v2147_v45 = vadd.f32 %v5368_v1, %v2063_v15 }
 0x35d   :  { %v2202_v5 = vadd.f32 %v5376_v32, %v2182_v10  ;;  %v2164_v12 = vmax.f32 %v2148_v40, 0.0 }
 0x35e   :  { %v2201_v26 = vadd.f32 %v5376_v32, %v2181_v34  ;;  %v2163_v31 = vmax.f32 %v2147_v45, 0.0  ;;  %v4100_v42 = vpop.f32.mrb[46].mxu1 }
 0x35f   :  { %2218 = vst.msk [vmem:[#allocation3 + $0x18] sm:$0xff] %vm747_vm5, %v2202_v5  ;;  %v2184_v50 = vmul.f32 %v5372_v7, %v2164_v12  ;;  %v2150_v47 = vadd.f32 %v4100_v42, %v5368_v1  ;;  %v2073_v8 = vpop.f32.mrb[47].mxu1 }
 0x360   :  { %2217 = vst.msk [vmem:[#allocation3 + $0x10] sm:$0xff] %vm747_vm5, %v2201_v26  ;;  %v2183_v20 = vmul.f32 %v5372_v7, %v2163_v31  ;;  %v2149_v59 = vadd.f32 %v5368_v1, %v2073_v8 }
 0x361   :  { %v2204_v57 = vadd.f32 %v5376_v32, %v2184_v50  ;;  %v2166_v36 = vmax.f32 %v2150_v47, 0.0 }
 0x362   :  { %v2203_v51 = vadd.f32 %v5376_v32, %v2183_v20  ;;  %v2165_v28 = vmax.f32 %v2149_v59, 0.0  ;;  %v4103_v55 = vpop.f32.mrb[48].mxu1 }
 0x363   :  { %2220 = vst.msk [vmem:[#allocation3 + $0x28] sm:$0xff] %vm747_vm5, %v2204_v57  ;;  %v2186_v56 = vmul.f32 %v5372_v7, %v2166_v36  ;;  %v2152_v9 = vadd.f32 %v4103_v55, %v5368_v1  ;;  %v2083_v4 = vpop.f32.mrb[49].mxu1  ;;  %v2260_v58 = vld [vmem:[#allocation3 + $0x1] sm:$0xff] }
 0x364   :  { %2219 = vst.msk [vmem:[#allocation3 + $0x20] sm:$0xff] %vm747_vm5, %v2203_v51  ;;  %v2185_v39 = vmul.f32 %v5372_v7, %v2165_v28  ;;  %v2151_v60 = vadd.f32 %v5368_v1, %v2083_v4  ;;  %4121 = vmatprep.mubr.msk.f32.mxu0 %vm747_vm5, %v2260_v58 }
 0x365   :  { %v2206_v11 = vadd.f32 %v5376_v32, %v2186_v56  ;;  %v2168_v16 = vmax.f32 %v2152_v9, 0.0 }
 0x366   :  { %v2205_v19 = vadd.f32 %v5376_v32, %v2185_v39  ;;  %v2167_v49 = vmax.f32 %v2151_v60, 0.0  ;;  %v4106_v24 = vpop.f32.mrb[50].mxu1  ;;  %v2243_v39 = vld [vmem:[%s5696_s8 + $0x58] sm:$0xff]  ;;  %v2244_v60 = vld [vmem:[#allocation3] sm:$0xff] }
 0x367   :  { %2222 = vst.msk [vmem:[#allocation3 + $0x38] sm:$0xff] %vm747_vm5, %v2206_v11  ;;  %v2188_v48 = vmul.f32 %v5372_v7, %v2168_v16  ;;  %v2154_v27 = vadd.f32 %v4106_v24, %v5368_v1  ;;  %v2093_v18 = vpop.f32.mrb[51].mxu1  ;;  %v2261_v43 = vld [vmem:[#allocation3 + $0x9] sm:$0xff]  ;;  %v2262_v29 = vld [vmem:[#allocation3 + $0x11] sm:$0xff]  ;;  %v4345_v11 = vpack.c.bf16 %v2243_v39, %v2242_v13 }
 0x368   :  { %2221 = vst.msk [vmem:[#allocation3 + $0x30] sm:$0xff] %vm747_vm5, %v2205_v19  ;;  %v2187_v14 = vmul.f32 %v5372_v7, %v2167_v49  ;;  %v2153_v44 = vadd.f32 %v5368_v1, %v2093_v18  ;;  %4122 = vmatmul.mubr.msk.f32.vlgmr.msra.gmra.mrb[24].mxu0 %vm747_vm5, %v2261_v43  ;;  %v2245_v16 = vld [vmem:[#allocation3 + $0x8] sm:$0xff]  ;;  %v2246_v19 = vld [vmem:[#allocation3 + $0x10] sm:$0xff]  ;;  %v2247_v49 = vld [vmem:[#allocation3 + $0x18] sm:$0xff] }
 0x369   :  { %v2208_v30 = vadd.f32 %v5376_v32, %v2188_v48  ;;  %v2170_v41 = vmax.f32 %v2154_v27, 0.0  ;;  %4124 = vmatprep.mubr.msk.f32.mxu0 %vm747_vm5, %v2262_v29  ;;  %4336 = vmatpush3.bf16.msra.mxu0 %v5349_v6 }
 0x36a   :  { %v2207_v53 = vadd.f32 %v5376_v32, %v2187_v14  ;;  %v2169_v17 = vmax.f32 %v2153_v44, 0.0  ;;  %v4109_v22 = vpop.f32.mrb[52].mxu1  ;;  %4338 = vmatprep.subr.bf16.mxu0 %v4337_v38 }
 0x36b   :  { %2224 = vst.msk [vmem:[#allocation3 + $0x48] sm:$0xff] %vm747_vm5, %v2208_v30  ;;  %v2190_v46 = vmul.f32 %v5372_v7, %v2170_v41  ;;  %v2156_v21 = vadd.f32 %v4109_v22, %v5368_v1  ;;  %v2103_v23 = vpop.f32.mrb[53].mxu1  ;;  %v2263_v35 = vld [vmem:[#allocation3 + $0x19] sm:$0xff]  ;;  %v2264_v61 = vld [vmem:[#allocation3 + $0x21] sm:$0xff] }
 0x36c   :  { %2223 = vst.msk [vmem:[#allocation3 + $0x40] sm:$0xff] %vm747_vm5, %v2207_v53  ;;  %v2189_v6 = vmul.f32 %v5372_v7, %v2169_v17  ;;  %v2155_v37 = vadd.f32 %v5368_v1, %v2103_v23  ;;  %4125 = vmatmul.mubr.msk.f32.gmra.mrb[26].mxu0 %vm747_vm5, %v2263_v35  ;;  %v2248_v24 = vld [vmem:[#allocation3 + $0x20] sm:$0xff]  ;;  %v2663_v53 = vld [vmem:[#allocation3 + $0xa] sm:$0xff]  ;;  %v2664_v17 = vld [vmem:[#allocation3 + $0x12] sm:$0xff] }
 0x36d   :  { %v2210_v54 = vadd.f32 %v5376_v32, %v2190_v46  ;;  %v2172_v10 = vmax.f32 %v2156_v21, 0.0  ;;  %4127 = vmatprep.mubr.msk.f32.mxu0 %vm747_vm5, %v2264_v61  ;;  %4340 = vmatpush3.bf16.msra.mxu0 %v4337_v38  ;;  %v2249_v38 = vld [vmem:[#allocation3 + $0x28] sm:$0xff]  ;;  %v2665_v22 = vld [vmem:[#allocation3 + $0x1a] sm:$0xff] }
 0x36e   :  { %v2209_v40 = vadd.f32 %v5376_v32, %v2189_v6  ;;  %v2171_v15 = vmax.f32 %v2155_v37, 0.0  ;;  %v4112_v34 = vpop.f32.mrb[54].mxu1  ;;  %4342 = vmatprep.subr.bf16.mxu0 %v5432_v33  ;;  %v2251_v48 = vld [vmem:[#allocation3 + $0x38] sm:$0xff]  ;;  %v2662_v41 = vld [vmem:[#allocation3 + $0x2] sm:$0xff] }
 0x36f   :  { %2226 = vst.msk [vmem:[#allocation3 + $0x58] sm:$0xff] %vm747_vm5, %v2210_v54  ;;  %v2192_v45 = vmul.f32 %v5372_v7, %v2172_v10  ;;  %v2158_v5 = vadd.f32 %v4112_v34, %v5368_v1  ;;  %v2113_v12 = vpop.f32.mrb[55].mxu1  ;;  %v2265_v26 = vld [vmem:[#allocation3 + $0x29] sm:$0xff]  ;;  %v2266_v31 = vld [vmem:[#allocation3 + $0x31] sm:$0xff] }
 0x370   :  { %2225 = vst.msk [vmem:[#allocation3 + $0x50] sm:$0xff] %vm747_vm5, %v2209_v40  ;;  %v2191_v42 = vmul.f32 %v5372_v7, %v2171_v15  ;;  %v2157_v50 = vadd.f32 %v5368_v1, %v2113_v12  ;;  %4128 = vmatmul.mubr.msk.f32.gmra.mrb[28].mxu0 %vm747_vm5, %v2265_v26  ;;  %v2250_v25 = vld [vmem:[#allocation3 + $0x30] sm:$0xff]  ;;  %v2887_v34 = vld [vmem:[%s5700_s9] sm:$0x7] }
 0x371   :  { %v2212_v47 = vadd.f32 %v5376_v32, %v2192_v45  ;;  %v2174_v8 = vmax.f32 %v2158_v5, 0.0  ;;  %4130 = vmatprep.mubr.msk.f32.mxu0 %vm747_vm5, %v2266_v31  ;;  %v2667_v46 = vld [vmem:[#allocation3 + $0x2a] sm:$0xff]  ;;  %v2668_v21 = vld [vmem:[#allocation3 + $0x32] sm:$0xff]  ;;  %v5515_v45 = vrot.slane %v2887_v34, %v4762_v63  ;;  %v5519_v26 = vrot.slane %v2887_v34, %v4771_v2 }
 0x372   :  { %v2211_v20 = vadd.f32 %v5376_v32, %v2191_v42  ;;  %v2173_v59 = vmax.f32 %v2157_v50, 0.0  ;;  %v2253_v18 = vld [vmem:[#allocation3 + $0x48] sm:$0xff] }
 0x373   :  { %2228 = vst.msk [vmem:[#allocation3 + $0x68] sm:$0xff] %vm747_vm5, %v2212_v47  ;;  %v2194_v57 = vmul.f32 %v5372_v7, %v2174_v8  ;;  %v2267_v36 = vld [vmem:[#allocation3 + $0x39] sm:$0xff]  ;;  %v2268_v51 = vld [vmem:[#allocation3 + $0x41] sm:$0xff]  ;;  %v5523_v47 = vrot.slane %v2887_v34, %v4774_v3 }
 0x374   :  { %2227 = vst.msk [vmem:[#allocation3 + $0x60] sm:$0xff] %vm747_vm5, %v2211_v20  ;;  %v2193_v1 = vmul.f32 %v5372_v7, %v2173_v59  ;;  %4131 = vmatmul.mubr.msk.f32.gmra.mrb[30].mxu0 %vm747_vm5, %v2267_v36  ;;  %v2252_v27 = vld [vmem:[#allocation3 + $0x40] sm:$0xff] }
 0x375   :  { %v2214_v28 = vadd.f32 %v5376_v32, %v2194_v57  ;;  %4133 = vmatprep.mubr.msk.f32.mxu0 %vm747_vm5, %v2268_v51  ;;  %v2669_v23 = vld [vmem:[#allocation3 + $0x3a] sm:$0xff]  ;;  %v2670_v35 = vld [vmem:[#allocation3 + $0x42] sm:$0xff] }
 0x376   :  { %v2213_v55 = vadd.f32 %v5376_v32, %v2193_v1  ;;  %v2255_v29 = vld [vmem:[#allocation3 + $0x58] sm:$0xff] }
 0x377   :  { %2230 = vst.msk [vmem:[#allocation3 + $0x78] sm:$0xff] %vm747_vm5, %v2214_v28  ;;  %v2269_v56 = vld [vmem:[#allocation3 + $0x49] sm:$0xff]  ;;  %v2270_v9 = vld [vmem:[#allocation3 + $0x51] sm:$0xff] }
 0x378   :  { %2229 = vst.msk [vmem:[#allocation3 + $0x70] sm:$0xff] %vm747_vm5, %v2213_v55  ;;  %4134 = vmatmul.mubr.msk.f32.gmra.mrb[32].mxu0 %vm747_vm5, %v2269_v56  ;;  %v2254_v43 = vld [vmem:[#allocation3 + $0x50] sm:$0xff] }
 0x379   :  { %4136 = vmatprep.mubr.msk.f32.mxu0 %vm747_vm5, %v2270_v9  ;;  %v2671_v61 = vld [vmem:[#allocation3 + $0x4a] sm:$0xff]  ;;  %v2672_v6 = vld [vmem:[#allocation3 + $0x52] sm:$0xff] }
 0x37a   :  { %v2257_v14 = vld [vmem:[#allocation3 + $0x68] sm:$0xff] }
 0x37b   :  { %v2271_v4 = vld [vmem:[#allocation3 + $0x59] sm:$0xff]  ;;  %v2272_v7 = vld [vmem:[#allocation3 + $0x61] sm:$0xff] }
 0x37c   :  { %4137 = vmatmul.mubr.msk.f32.gmra.mrb[34].mxu0 %vm747_vm5, %v2271_v4  ;;  %v2256_v52 = vld [vmem:[#allocation3 + $0x60] sm:$0xff] }
 0x37d   :  { %4139 = vmatprep.mubr.msk.f32.mxu0 %vm747_vm5, %v2272_v7  ;;  %v2673_v37 = vld [vmem:[#allocation3 + $0x5a] sm:$0xff]  ;;  %v2674_v54 = vld [vmem:[#allocation3 + $0x62] sm:$0xff] }
 0x37e   :  { %v2275_v32 = vld [vmem:[#allocation3 + $0x79] sm:$0xff] }
 0x37f   :  { %v2273_v58 = vld [vmem:[#allocation3 + $0x69] sm:$0xff]  ;;  %v2274_v0 = vld [vmem:[#allocation3 + $0x71] sm:$0xff]  ;;  %v2677_v15 = vld [vmem:[#allocation3 + $0x7a] sm:$0xff] }
 0x380   :  { %4140 = vmatmul.mubr.msk.f32.gmra.mrb[36].mxu0 %vm747_vm5, %v2273_v58  ;;  %v2258_v44 = vld [vmem:[#allocation3 + $0x70] sm:$0xff]  ;;  %v2259_v30 = vld [vmem:[#allocation3 + $0x78] sm:$0xff] }
 0x381   :  { %4142 = vmatprep.mubr.msk.f32.mxu0 %vm747_vm5, %v2274_v0  ;;  %v2675_v10 = vld [vmem:[#allocation3 + $0x6a] sm:$0xff]  ;;  %v2676_v40 = vld [vmem:[#allocation3 + $0x72] sm:$0xff] }
 0x384   :  { %4143 = vmatmul.mubr.msk.f32.gmra.mrb[38].mxu0 %vm747_vm5, %v2275_v32 }
 0x385   :  { %4153 = vmatprep.mubr.msk.f32.mxu0 %vm747_vm5, %v2244_v60 }
 0x388   :  { %4154 = vmatmul.mubr.msk.f32.vlgmr.msra.gmra.mrb[24].mxu0 %vm747_vm5, %v2245_v16 }
 0x389   :  { %4156 = vmatprep.mubr.msk.f32.mxu0 %vm747_vm5, %v2246_v19  ;;  %4344 = vmatpush3.bf16.msra.mxu0 %v5432_v33  ;;  %v2666_v33 = vld [vmem:[#allocation3 + $0x22] sm:$0xff] }
 0x38a   :  { %4346 = vmatprep.subr.bf16.mxu0 %v4345_v11 }
 0x38c   :  { %4157 = vmatmul.mubr.msk.f32.gmra.mrb[26].mxu0 %vm747_vm5, %v2247_v49 }
 0x38d   :  { %4159 = vmatprep.mubr.msk.f32.mxu0 %vm747_vm5, %v2248_v24  ;;  %4348 = vmatpush3.bf16.msra.mxu0 %v4345_v11 }
 0x390   :  { %4160 = vmatmul.mubr.msk.f32.gmra.mrb[28].mxu0 %vm747_vm5, %v2249_v38 }
 0x391   :  { %4162 = vmatprep.mubr.msk.f32.mxu0 %vm747_vm5, %v2250_v25 }
 0x394   :  { %4163 = vmatmul.mubr.msk.f32.gmra.mrb[30].mxu0 %vm747_vm5, %v2251_v48 }
 0x395   :  { %4165 = vmatprep.mubr.msk.f32.mxu0 %vm747_vm5, %v2252_v27 }
 0x398   :  { %4166 = vmatmul.mubr.msk.f32.gmra.mrb[32].mxu0 %vm747_vm5, %v2253_v18 }
 0x399   :  { %4168 = vmatprep.mubr.msk.f32.mxu0 %vm747_vm5, %v2254_v43 }
 0x39c   :  { %4169 = vmatmul.mubr.msk.f32.gmra.mrb[34].mxu0 %vm747_vm5, %v2255_v29 }
 0x39d   :  { %4171 = vmatprep.mubr.msk.f32.mxu0 %vm747_vm5, %v2256_v52 }
 0x3a0   :  { %4172 = vmatmul.mubr.msk.f32.gmra.mrb[36].mxu0 %vm747_vm5, %v2257_v14 }
 0x3a1   :  { %4174 = vmatprep.mubr.msk.f32.mxu0 %vm747_vm5, %v2258_v44 }
 0x3a4   :  { %4175 = vmatmul.mubr.msk.f32.gmra.mrb[38].mxu0 %vm747_vm5, %v2259_v30 }
 0x3a5   :  { %4185 = vmatprep.mubr.msk.f32.mxu0 %vm747_vm5, %v2662_v41 }
 0x3a8   :  { %4186 = vmatmul.mubr.msk.f32.vlgmr.msra.gmra.mrb[24].mxu0 %vm747_vm5, %v2663_v53 }
 0x3a9   :  { %4188 = vmatprep.mubr.msk.f32.mxu0 %vm747_vm5, %v2664_v17 }
 0x3ac   :  { %4189 = vmatmul.mubr.msk.f32.gmra.mrb[26].mxu0 %vm747_vm5, %v2665_v22 }
 0x3ad   :  { %4191 = vmatprep.mubr.msk.f32.mxu0 %vm747_vm5, %v2666_v33 }
 0x3b0   :  { %4192 = vmatmul.mubr.msk.f32.gmra.mrb[28].mxu0 %vm747_vm5, %v2667_v46 }
 0x3b1   :  { %4194 = vmatprep.mubr.msk.f32.mxu0 %vm747_vm5, %v2668_v21 }
 0x3b4   :  { %4195 = vmatmul.mubr.msk.f32.gmra.mrb[30].mxu0 %vm747_vm5, %v2669_v23 }
 0x3b5   :  { %4197 = vmatprep.mubr.msk.f32.mxu0 %vm747_vm5, %v2670_v35 }
 0x3b8   :  { %4198 = vmatmul.mubr.msk.f32.gmra.mrb[32].mxu0 %vm747_vm5, %v2671_v61 }
 0x3b9   :  { %4200 = vmatprep.mubr.msk.f32.mxu0 %vm747_vm5, %v2672_v6 }
 0x3bc   :  { %4201 = vmatmul.mubr.msk.f32.gmra.mrb[34].mxu0 %vm747_vm5, %v2673_v37 }
 0x3bd   :  { %4203 = vmatprep.mubr.msk.f32.mxu0 %vm747_vm5, %v2674_v54 }
 0x3c0   :  { %4204 = vmatmul.mubr.msk.f32.gmra.mrb[36].mxu0 %vm747_vm5, %v2675_v10 }
 0x3c1   :  { %4206 = vmatprep.mubr.msk.f32.mxu0 %vm747_vm5, %v2676_v40 }
 0x3c4   :  { %4207 = vmatmul.mubr.msk.f32.gmra.mrb[38].mxu0 %vm747_vm5, %v2677_v15 }
 0x47b   :  { %v4187_v5 = vpop.f32.mrb[24].mxu0 }
 0x47c   :  { %v2893_v12 = vadd.f32 %v4187_v5, %v5515_v45  ;;  %v2792_v31 = vpop.f32.mrb[25].mxu0 }
 0x47d   :  { %v2892_v42 = vadd.f32 %v5515_v45, %v2792_v31 }
 0x47e   :  { %v2909_v50 = vmax.f32 %v2893_v12, 0.0 }
 0x47f   :  { %v2908_v8 = vmax.f32 %v2892_v42, 0.0  ;;  %v4190_v20 = vpop.f32.mrb[26].mxu0 }
 0x480   :  { %v2929_v59 = vmul.f32 %v5519_v26, %v2909_v50  ;;  %v2895_v57 = vadd.f32 %v4190_v20, %v5515_v45  ;;  %v2802_v36 = vpop.f32.mrb[27].mxu0 }
 0x481   :  { %v2928_v51 = vmul.f32 %v5519_v26, %v2908_v8  ;;  %v2894_v1 = vadd.f32 %v5515_v45, %v2802_v36 }
 0x482   :  { %v2911_v28 = vmax.f32 %v2895_v57, 0.0  ;;  %v2949_v4 = vadd.f32 %v5523_v47, %v2929_v59 }
 0x483   :  { %v2948_v55 = vadd.f32 %v5523_v47, %v2928_v51  ;;  %v2910_v56 = vmax.f32 %v2894_v1, 0.0  ;;  %v4193_v9 = vpop.f32.mrb[28].mxu0 }
 0x484   :  { %v2931_v7 = vmul.f32 %v5519_v26, %v2911_v28  ;;  %v2897_v58 = vadd.f32 %v4193_v9, %v5515_v45  ;;  %v2812_v0 = vpop.f32.mrb[29].mxu0 }
 0x485   :  { %v2930_v32 = vmul.f32 %v5519_v26, %v2910_v56  ;;  %v2896_v13 = vadd.f32 %v5515_v45, %v2812_v0  ;;  %4217 = vmatprep.mubr.msk.f32.mxu1 %vm747_vm5, %v2948_v55 }
 0x486   :  { %v2913_v39 = vmax.f32 %v2897_v58, 0.0  ;;  %4218 = vmatmul.mubr.msk.f32.vlgmr.msra.gmra.mrb[56].mxu1 %vm747_vm5, %v2949_v4  ;;  %v2951_v19 = vadd.f32 %v5523_v47, %v2931_v7 }
 0x487   :  { %v2950_v60 = vadd.f32 %v5523_v47, %v2930_v32  ;;  %v2912_v11 = vmax.f32 %v2896_v13, 0.0  ;;  %v4196_v16 = vpop.f32.mrb[30].mxu0 }
 0x488   :  { %v2933_v49 = vmul.f32 %v5519_v26, %v2913_v39  ;;  %v2899_v24 = vadd.f32 %v4196_v16, %v5515_v45  ;;  %v2822_v38 = vpop.f32.mrb[31].mxu0  ;;  %v2968_v39 = vld [vmem:[%s5701_s11] sm:$0x7] }
 0x489   :  { %v2932_v25 = vmul.f32 %v5519_v26, %v2912_v11  ;;  %v2898_v48 = vadd.f32 %v5515_v45, %v2822_v38  ;;  %4220 = vmatprep.mubr.msk.f32.mxu1 %vm747_vm5, %v2950_v60  ;;  %v5591_v60 = vrot.slane %v2968_v39, %v4762_v63  ;;  %v5595_v16 = vrot.slane %v2968_v39, %v4771_v2 }
 0x48a   :  { %v2915_v27 = vmax.f32 %v2899_v24, 0.0  ;;  %4221 = vmatmul.mubr.msk.f32.gmra.mrb[58].mxu1 %vm747_vm5, %v2951_v19  ;;  %v2953_v52 = vadd.f32 %v5523_v47, %v2933_v49  ;;  %v5602_v38 = vrot.slane %v2968_v39, %v4774_v3 }
 0x48b   :  { %v2952_v18 = vadd.f32 %v5523_v47, %v2932_v25  ;;  %v2914_v43 = vmax.f32 %v2898_v48, 0.0  ;;  %v4199_v29 = vpop.f32.mrb[32].mxu0 }
 0x48c   :  { %v2935_v14 = vmul.f32 %v5519_v26, %v2915_v27  ;;  %v2901_v44 = vadd.f32 %v4199_v29, %v5515_v45  ;;  %v2832_v30 = vpop.f32.mrb[33].mxu0 }
 0x48d   :  { %v2934_v41 = vmul.f32 %v5519_v26, %v2914_v43  ;;  %v2900_v53 = vadd.f32 %v5515_v45, %v2832_v30  ;;  %4223 = vmatprep.mubr.msk.f32.mxu1 %vm747_vm5, %v2952_v18 }
 0x48e   :  { %v2917_v17 = vmax.f32 %v2901_v44, 0.0  ;;  %4224 = vmatmul.mubr.msk.f32.gmra.mrb[60].mxu1 %vm747_vm5, %v2953_v52  ;;  %v2955_v21 = vadd.f32 %v5523_v47, %v2935_v14 }
 0x48f   :  { %v2954_v22 = vadd.f32 %v5523_v47, %v2934_v41  ;;  %v2916_v33 = vmax.f32 %v2900_v53, 0.0  ;;  %v4202_v46 = vpop.f32.mrb[34].mxu0 }
 0x490   :  { %v2937_v23 = vmul.f32 %v5519_v26, %v2917_v17  ;;  %v2903_v35 = vadd.f32 %v4202_v46, %v5515_v45  ;;  %v2842_v61 = vpop.f32.mrb[35].mxu0 }
 0x491   :  { %v2936_v6 = vmul.f32 %v5519_v26, %v2916_v33  ;;  %v2902_v37 = vadd.f32 %v5515_v45, %v2842_v61  ;;  %4226 = vmatprep.mubr.msk.f32.mxu1 %vm747_vm5, %v2954_v22 }
 0x492   :  { %v2919_v54 = vmax.f32 %v2903_v35, 0.0  ;;  %4227 = vmatmul.mubr.msk.f32.gmra.mrb[62].mxu1 %vm747_vm5, %v2955_v21  ;;  %v2957_v34 = vadd.f32 %v5523_v47, %v2937_v23 }
 0x493   :  { %v2956_v10 = vadd.f32 %v5523_v47, %v2936_v6  ;;  %v2918_v40 = vmax.f32 %v2902_v37, 0.0  ;;  %v4205_v15 = vpop.f32.mrb[36].mxu0 }
 0x494   :  { %v2939_v5 = vmul.f32 %v5519_v26, %v2919_v54  ;;  %v2905_v12 = vadd.f32 %v4205_v15, %v5515_v45  ;;  %v2852_v31 = vpop.f32.mrb[37].mxu0 }
 0x495   :  { %v2938_v42 = vmul.f32 %v5519_v26, %v2918_v40  ;;  %v2904_v50 = vadd.f32 %v5515_v45, %v2852_v31  ;;  %4229 = vmatprep.mubr.msk.f32.mxu1 %vm747_vm5, %v2956_v10 }
 0x496   :  { %v2921_v8 = vmax.f32 %v2905_v12, 0.0  ;;  %4230 = vmatmul.mubr.msk.f32.gmra.mrb[64].mxu1 %vm747_vm5, %v2957_v34  ;;  %v2959_v36 = vadd.f32 %v5523_v47, %v2939_v5 }
 0x497   :  { %v2958_v20 = vadd.f32 %v5523_v47, %v2938_v42  ;;  %v2920_v59 = vmax.f32 %v2904_v50, 0.0  ;;  %v4208_v57 = vpop.f32.mrb[38].mxu0 }
 0x498   :  { %v2941_v51 = vmul.f32 %v5519_v26, %v2921_v8  ;;  %v2907_v1 = vadd.f32 %v4208_v57, %v5515_v45  ;;  %v2862_v28 = vpop.f32.mrb[39].mxu0 }
 0x499   :  { %v2940_v55 = vmul.f32 %v5519_v26, %v2920_v59  ;;  %v2906_v56 = vadd.f32 %v5515_v45, %v2862_v28  ;;  %4232 = vmatprep.mubr.msk.f32.mxu1 %vm747_vm5, %v2958_v20 }
 0x49a   :  { %v2923_v9 = vmax.f32 %v2907_v1, 0.0  ;;  %4233 = vmatmul.mubr.msk.f32.gmra.mrb[66].mxu1 %vm747_vm5, %v2959_v36  ;;  %v2961_v58 = vadd.f32 %v5523_v47, %v2941_v51 }
 0x49b   :  { %v2960_v4 = vadd.f32 %v5523_v47, %v2940_v55  ;;  %v2922_v7 = vmax.f32 %v2906_v56, 0.0 }
 0x49c   :  { %v2943_v0 = vmul.f32 %v5519_v26, %v2923_v9 }
 0x49d   :  { %v2942_v32 = vmul.f32 %v5519_v26, %v2922_v7  ;;  %4235 = vmatprep.mubr.msk.f32.mxu1 %vm747_vm5, %v2960_v4 }
 0x49e   :  { %4236 = vmatmul.mubr.msk.f32.gmra.mrb[68].mxu1 %vm747_vm5, %v2961_v58  ;;  %v2963_v13 = vadd.f32 %v5523_v47, %v2943_v0 }
 0x49f   :  { %v2962_v45 = vadd.f32 %v5523_v47, %v2942_v32  ;;  %v5598_v47 = vadd.s32 8, %v4759_v62 }
 0x4a1   :  { %4238 = vmatprep.mubr.msk.f32.mxu1 %vm747_vm5, %v2962_v45  ;;  %vm3226_vm7 = vcmp.lt.s32.totalorder %v5598_v47, 9 }
 0x4a2   :  { %4239 = vmatmul.mubr.msk.f32.gmra.mrb[70].mxu1 %vm747_vm5, %v2963_v13 }
 0x559   :  { %v4219_v26 = vpop.f32.mrb[56].mxu1 }
 0x55a   :  { %v3093_v11 = vadd.f32 %v4219_v26, %v5591_v60  ;;  %v3087_v19 = vpop.f32.mrb[57].mxu1 }
 0x55b   :  { %v3088_v49 = vadd.f32 %v3087_v19, %v5591_v60 }
 0x55c   :  { %v3167_v24 = vmax.f32 %v3093_v11, 0.0 }
 0x55d   :  { %v3166_v25 = vmax.f32 %v3088_v49, 0.0  ;;  %v4222_v48 = vpop.f32.mrb[58].mxu1 }
 0x55e   :  { %v3187_v63 = vmul.f32 %v5595_v16, %v3167_v24  ;;  %v3103_v27 = vadd.f32 %v4222_v48, %v5591_v60  ;;  %v3097_v18 = vpop.f32.mrb[59].mxu1 }
 0x55f   :  { %v3186_v2 = vmul.f32 %v5595_v16, %v3166_v25  ;;  %v3098_v62 = vadd.f32 %v3097_v18, %v5591_v60 }
 0x560   :  { %v3207_v43 = vadd.f32 %v5602_v38, %v3187_v63  ;;  %v3169_v29 = vmax.f32 %v3103_v27, 0.0 }
 0x561   :  { %v3206_v52 = vadd.f32 %v5602_v38, %v3186_v2  ;;  %v3168_v3 = vmax.f32 %v3098_v62, 0.0  ;;  %v4225_v14 = vpop.f32.mrb[60].mxu1 }
 0x562   :  { %v3228_v44 = vsel %vm3226_vm7, %v3207_v43, -inf  ;;  %v3189_v30 = vmul.f32 %v5595_v16, %v3169_v29  ;;  %v3113_v41 = vadd.f32 %v4225_v14, %v5591_v60  ;;  %v3107_v53 = vpop.f32.mrb[61].mxu1 }
 0x563   :  { %v3244_v17 = vsel %vm747_vm5, %v3228_v44, -inf  ;;  %v3243_v22 = vsel %vm747_vm5, %v3206_v52, -inf  ;;  %v3188_v33 = vmul.f32 %v5595_v16, %v3168_v3  ;;  %v3108_v46 = vadd.f32 %v3107_v53, %v5591_v60 }
 0x564   :  { %v3245_v21 = vmax.f32 %v3243_v22, %v3244_v17  ;;  %v3209_v23 = vadd.f32 %v5602_v38, %v3189_v30  ;;  %v3171_v35 = vmax.f32 %v3113_v41, 0.0 }
 0x565   :  { %v3208_v61 = vadd.f32 %v5602_v38, %v3188_v33  ;;  %v3170_v6 = vmax.f32 %v3108_v46, 0.0  ;;  %v4228_v37 = vpop.f32.mrb[62].mxu1 }
 0x566   :  { %v3246_v54 = vrot.slane %v3245_v21, 4  ;;  %v3230_v10 = vsel %vm3226_vm7, %v3209_v23, -inf  ;;  %v3191_v40 = vmul.f32 %v5595_v16, %v3171_v35  ;;  %v3123_v15 = vadd.f32 %v4228_v37, %v5591_v60  ;;  %v3117_v34 = vpop.f32.mrb[63].mxu1 }
 0x567   :  { %v3253_v5 = vsel %vm747_vm5, %v3230_v10, -inf  ;;  %v3252_v12 = vsel %vm747_vm5, %v3208_v61, -inf  ;;  %v3190_v31 = vmul.f32 %v5595_v16, %v3170_v6  ;;  %v3118_v42 = vadd.f32 %v3117_v34, %v5591_v60 }
 0x568   :  { %v3247_v50 = vmax.f32 %v3245_v21, %v3246_v54  ;;  %v3254_v8 = vmax.f32 %v3252_v12, %v3253_v5  ;;  %v3211_v20 = vadd.f32 %v5602_v38, %v3191_v40  ;;  %v3173_v59 = vmax.f32 %v3123_v15, 0.0 }
 0x569   :  { %v3210_v57 = vadd.f32 %v5602_v38, %v3190_v31  ;;  %v3172_v36 = vmax.f32 %v3118_v42, 0.0  ;;  %v4231_v51 = vpop.f32.mrb[64].mxu1 }
 0x56a   :  { %v3248_v1 = vrot.slane %v3247_v50, 2  ;;  %v3255_v28 = vrot.slane %v3254_v8, 4  ;;  %v3232_v55 = vsel %vm3226_vm7, %v3211_v20, -inf  ;;  %v3193_v56 = vmul.f32 %v5595_v16, %v3173_v59  ;;  %v3127_v9 = vpop.f32.mrb[65].mxu1 }
 0x56b   :  { %v3262_v4 = vsel %vm747_vm5, %v3232_v55, -inf  ;;  %v3261_v7 = vsel %vm747_vm5, %v3210_v57, -inf  ;;  %v3192_v58 = vmul.f32 %v5595_v16, %v3172_v36  ;;  %v3133_v0 = vadd.f32 %v4231_v51, %v5591_v60 }
 0x56c   :  { %v3249_v32 = vmax.f32 %v3247_v50, %v3248_v1  ;;  %v3256_v45 = vmax.f32 %v3254_v8, %v3255_v28  ;;  %v3263_v13 = vmax.f32 %v3261_v7, %v3262_v4  ;;  %v3213_v39 = vadd.f32 %v5602_v38, %v3193_v56 }
 0x56d   :  { %v3212_v26 = vadd.f32 %v5602_v38, %v3192_v58  ;;  %v3175_v11 = vmax.f32 %v3133_v0, 0.0  ;;  %v3128_v19 = vadd.f32 %v3127_v9, %v5591_v60  ;;  %v4234_v49 = vpop.f32.mrb[66].mxu1 }
 0x56e   :  { %v3250_v24 = vrot.slane %v3249_v32, 1  ;;  %v3257_v25 = vrot.slane %v3256_v45, 2  ;;  %v3264_v48 = vrot.slane %v3263_v13, 4  ;;  %v3234_v63 = vsel %vm3226_vm7, %v3213_v39, -inf  ;;  %v3137_v27 = vpop.f32.mrb[67].mxu1 }
 0x56f   :  { %v3271_v18 = vsel %vm747_vm5, %v3234_v63, -inf  ;;  %v3270_v2 = vsel %vm747_vm5, %v3212_v26, -inf  ;;  %v3195_v62 = vmul.f32 %v5595_v16, %v3175_v11  ;;  %v3174_v43 = vmax.f32 %v3128_v19, 0.0 }
 0x570   :  { %v3251_v29 = vmax.f32 %v3249_v32, %v3250_v24  ;;  %v3258_v52 = vmax.f32 %v3256_v45, %v3257_v25  ;;  %v3265_v3 = vmax.f32 %v3263_v13, %v3264_v48  ;;  %v3272_v14 = vmax.f32 %v3270_v2, %v3271_v18 }
 0x571   :  { %v3215_v44 = vadd.f32 %v5602_v38, %v3195_v62  ;;  %v3194_v30 = vmul.f32 %v5595_v16, %v3174_v43  ;;  %v3143_v41 = vadd.f32 %v4234_v49, %v5591_v60  ;;  %v3138_v53 = vadd.f32 %v3137_v27, %v5591_v60  ;;  %v4237_v17 = vpop.f32.mrb[68].mxu1 }
 0x572   :  { %v3259_v22 = vrot.slane %v3258_v52, 1  ;;  %v3266_v33 = vrot.slane %v3265_v3, 2  ;;  %v3273_v46 = vrot.slane %v3272_v14, 4  ;;  %v3153_v21 = vadd.f32 %v4237_v17, %v5591_v60  ;;  %v3147_v23 = vpop.f32.mrb[69].mxu1 }
 0x573   :  { %v3236_v35 = vsel %vm3226_vm7, %v3215_v44, -inf  ;;  %v3214_v61 = vadd.f32 %v5602_v38, %v3194_v30  ;;  %v3177_v6 = vmax.f32 %v3143_v41, 0.0  ;;  %v3176_v37 = vmax.f32 %v3138_v53, 0.0 }
 0x574   :  { %v3260_v54 = vmax.f32 %v3258_v52, %v3259_v22  ;;  %v3267_v10 = vmax.f32 %v3265_v3, %v3266_v33  ;;  %v3274_v40 = vmax.f32 %v3272_v14, %v3273_v46  ;;  %v3280_v15 = vsel %vm747_vm5, %v3236_v35, -inf }
 0x575   :  { %v3279_v34 = vsel %vm747_vm5, %v3214_v61, -inf  ;;  %v3197_v5 = vmul.f32 %v5595_v16, %v3177_v6  ;;  %v3196_v12 = vmul.f32 %v5595_v16, %v3176_v37  ;;  %v3179_v31 = vmax.f32 %v3153_v21, 0.0  ;;  %v4240_v42 = vpop.f32.mrb[70].mxu1 }
 0x576   :  { %v3324_v50 = vsel %vm3323_vm8, %v3260_v54, %v3251_v29  ;;  %v3268_v8 = vrot.slane %v3267_v10, 1  ;;  %v3275_v20 = vrot.slane %v3274_v40, 2  ;;  %v3281_v59 = vmax.f32 %v3279_v34, %v3280_v15  ;;  %v3157_v57 = vpop.f32.mrb[71].mxu1 }
 0x577   :  { %v3217_v36 = vadd.f32 %v5602_v38, %v3197_v5  ;;  %v3216_v51 = vadd.f32 %v5602_v38, %v3196_v12  ;;  %v3199_v1 = vmul.f32 %v5595_v16, %v3179_v31  ;;  %v3148_v28 = vadd.f32 %v3147_v23, %v5591_v60 }
 0x578   :  { %v3269_v55 = vmax.f32 %v3267_v10, %v3268_v8  ;;  %v3276_v56 = vmax.f32 %v3274_v40, %v3275_v20  ;;  %v3282_v9 = vrot.slane %v3281_v59, 4  ;;  %v3163_v4 = vadd.f32 %v4240_v42, %v5591_v60 }
 0x579   :  { %v3238_v7 = vsel %vm3226_vm7, %v3217_v36, -inf  ;;  %v3288_v58 = vsel %vm747_vm5, %v3216_v51, -inf  ;;  %v3219_v0 = vadd.f32 %v5602_v38, %v3199_v1  ;;  %v3178_v32 = vmax.f32 %v3148_v28, 0.0 }
 0x57a   :  { %v3326_v45 = vsel %vm3325_vm9, %v3269_v55, %v3324_v50  ;;  %v3277_v13 = vrot.slane %v3276_v56, 1  ;;  %v3283_v39 = vmax.f32 %v3281_v59, %v3282_v9  ;;  %v3289_v26 = vsel %vm747_vm5, %v3238_v7, -inf }
 0x57b   :  { %v3290_v11 = vmax.f32 %v3288_v58, %v3289_v26  ;;  %v3240_v19 = vsel %vm3226_vm7, %v3219_v0, -inf  ;;  %v3198_v49 = vmul.f32 %v5595_v16, %v3178_v32  ;;  %v3181_v24 = vmax.f32 %v3163_v4, 0.0 }
 0x57c   :  { %v3278_v25 = vmax.f32 %v3276_v56, %v3277_v13  ;;  %v3284_v48 = vrot.slane %v3283_v39, 2  ;;  %v3158_v63 = vadd.f32 %v3157_v57, %v5591_v60  ;;  %v3298_v18 = vsel %vm747_vm5, %v3240_v19, -inf }
 0x57d   :  { %v3291_v27 = vrot.slane %v3290_v11, 4  ;;  %v3218_v2 = vadd.f32 %v5602_v38, %v3198_v49  ;;  %v3201_v62 = vmul.f32 %v5595_v16, %v3181_v24 }
 0x57e   :  { %v3328_v43 = vsel %vm3327_vm10, %v3278_v25, %v3326_v45  ;;  %v3285_v29 = vmax.f32 %v3283_v39, %v3284_v48  ;;  %v3180_v52 = vmax.f32 %v3158_v63, 0.0 }
 0x57f   :  { %v3292_v3 = vmax.f32 %v3290_v11, %v3291_v27  ;;  %v3297_v14 = vsel %vm747_vm5, %v3218_v2, -inf  ;;  %v3221_v44 = vadd.f32 %v5602_v38, %v3201_v62 }
 0x580   :  { %v3286_v30 = vrot.slane %v3285_v29, 1  ;;  %v3299_v41 = vmax.f32 %v3297_v14, %v3298_v18  ;;  %v3200_v60 = vmul.f32 %v5595_v16, %v3180_v52 }
 0x581   :  { %v3293_v53 = vrot.slane %v3292_v3, 2  ;;  %v3242_v17 = vsel %vm3226_vm7, %v3221_v44, -inf }
 0x582   :  { %v3287_v22 = vmax.f32 %v3285_v29, %v3286_v30  ;;  %v3300_v33 = vrot.slane %v3299_v41, 4  ;;  %v3307_v46 = vsel %vm747_vm5, %v3242_v17, -inf  ;;  %v3220_v21 = vadd.f32 %v5602_v38, %v3200_v60 }
 0x583   :  { %v3294_v23 = vmax.f32 %v3292_v3, %v3293_v53 }
 0x584   :  { %v3330_v35 = vsel %vm3329_vm11, %v3287_v22, %v3328_v43  ;;  %v3301_v61 = vmax.f32 %v3299_v41, %v3300_v33  ;;  %v3306_v6 = vsel %vm747_vm5, %v3220_v21, -inf }
 0x585   :  { %v3295_v37 = vrot.slane %v3294_v23, 1  ;;  %v3308_v54 = vmax.f32 %v3306_v6, %v3307_v46 }
 0x586   :  { %v3302_v16 = vrot.slane %v3301_v61, 2 }
 0x587   :  { %v3296_v10 = vmax.f32 %v3294_v23, %v3295_v37  ;;  %v3309_v40 = vrot.slane %v3308_v54, 4 }
 0x588   :  { %v3303_v15 = vmax.f32 %v3301_v61, %v3302_v16 }
 0x589   :  { %v3332_v47 = vsel %vm3331_vm12, %v3296_v10, %v3330_v35  ;;  %v3310_v34 = vmax.f32 %v3308_v54, %v3309_v40 }
 0x58a   :  { %v3304_v5 = vrot.slane %v3303_v15, 1 }
 0x58b   :  { %v3311_v12 = vrot.slane %v3310_v34, 2 }
 0x58c   :  { %v3305_v31 = vmax.f32 %v3303_v15, %v3304_v5 }
 0x58d   :  { %v3312_v42 = vmax.f32 %v3310_v34, %v3311_v12 }
 0x58e   :  { %v3334_v38 = vsel %vm3333_vm13, %v3305_v31, %v3332_v47 }
 0x58f   :  { %v3313_v50 = vrot.slane %v3312_v42, 1 }
 0x591   :  { %v3314_v8 = vmax.f32 %v3312_v42, %v3313_v50 }
 0x593   :  { %v3336_v20 = vsel %vm3335_vm14, %v3314_v8, %v3334_v38 }
 0x594   :  { %3338 = vst.msk [vmem:[%s5702_s12] sm:$0xff] %vm747_vm5, %v3336_v20 }

</bundles_post_ra>
